<compile_context>
chip_gen: v7x
topology: tpu7x:2x2x1
jax: 0.10.0
libtpu: 0.0.40
codegen_flags: <defaults>
</compile_context>

<pallas_src>
import functools
import math

import jax
import jax.numpy as jnp
from jax import lax
from jax.experimental import pallas as pl
from jax.experimental.pallas import tpu as pltpu

_EPS = 1e-6  # matches nn.LayerNorm(hidden_size, eps=1e-06) in the module


# ------------------------------ kernel ------------------------------------- #

def _layernorm_f32(x, g, b):
    mu = jnp.mean(x, axis=-1, keepdims=True)
    xc = x - mu
    var = jnp.mean(xc * xc, axis=-1, keepdims=True)
    return xc * lax.rsqrt(var + _EPS) * g + b


def _fused_cab_kernel(q_ref, kv_ref,
                      gq_ref, betaq_ref, gkv_ref, betakv_ref,
                      wq_ref, bq_ref, wk_ref, bk_ref, wv_ref, bv_ref,
                      wo_ref, bo_ref,
                      o_ref, *, num_heads, scale):
    # One batch element per grid step.  Blocks:
    #   q_ref  (1, Lq,  D)   kv_ref (1, Lkv, D)
    #   w*_ref (D, D) bf16 (pre-transposed: in x out), b*_ref / LN params (1, D)
    #   o_ref  (1, Lq,  D)
    D = wq_ref.shape[0]
    hd = D // num_heads
    cdt = wq_ref.dtype  # bf16 compute dtype for MXU operands

    # ---- LayerNorm (f32) + fused Q/K/V projections (bf16 x bf16 -> f32) ----
    qn = _layernorm_f32(q_ref[0, :, :].astype(jnp.float32),
                        gq_ref[...], betaq_ref[...])          # (Lq,  D)
    kvn = _layernorm_f32(kv_ref[0, :, :].astype(jnp.float32),
                         gkv_ref[...], betakv_ref[...])        # (Lkv, D)
    qn_c = qn.astype(cdt)
    kvn_c = kvn.astype(cdt)

    q = (jnp.dot(qn_c, wq_ref[...], preferred_element_type=jnp.float32)
         + bq_ref[...]).astype(cdt)                            # (Lq,  D)
    k = (jnp.dot(kvn_c, wk_ref[...], preferred_element_type=jnp.float32)
         + bk_ref[...]).astype(cdt)                            # (Lkv, D)
    v = (jnp.dot(kvn_c, wv_ref[...], preferred_element_type=jnp.float32)
         + bv_ref[...]).astype(cdt)                            # (Lkv, D)

    wo = wo_ref[...]                                           # (D, D) bf16

    # ---- per-head attention fused with out_proj (lane-dense accumulator) ---
    Lq = q.shape[0]
    acc = jnp.zeros((Lq, D), jnp.float32)
    for h in range(num_heads):                                 # static unroll
        lo, hi = h * hd, (h + 1) * hd
        qh, kh, vh = q[:, lo:hi], k[:, lo:hi], v[:, lo:hi]     # (L, hd)
        s = lax.dot_general(qh, kh, (((1,), (1,)), ((), ())),
                            preferred_element_type=jnp.float32) * scale
        m = jnp.max(s, axis=-1, keepdims=True)
        p = jnp.exp(s - m)                                     # (Lq, Lkv) f32
        inv_l = pl.reciprocal(jnp.sum(p, axis=-1, keepdims=True), approx=True)
        pv = jnp.dot(p.astype(cdt), vh,
                     preferred_element_type=jnp.float32) * inv_l   # (Lq, hd)
        acc = acc + jnp.dot(pv.astype(cdt), wo[lo:hi, :],
                            preferred_element_type=jnp.float32)    # (Lq, D)

    o_ref[0, :, :] = (acc + bo_ref[...]).astype(o_ref.dtype)


# ------------------------------ wrapper ------------------------------------ #

def cross_attention_block(params, queries, keys_values, attention_mask=None):
    """Pallas equivalent of CrossAttentionBlock.forward (inference/eval path)."""
    if attention_mask is not None:
        # TODO(synk): attention_mask not implemented — the PyTorch module's flash
        # and fallback paths apply opposite boolean mask semantics.
        raise NotImplementedError("attention_mask is not supported")
    # TODO(synk): dropout omitted (eval mode => p=0 in the reference module).

    B, Lq, D = queries.shape
    Lkv = keys_values.shape[1]
    H = params["num_heads"]
    hd = D // H
    scale = 1.0 / math.sqrt(hd) if hd > 0 else 1.0

    kernel = functools.partial(_fused_cab_kernel, num_heads=H, scale=scale)
    const2 = lambda b: (0, 0)          # weights / biases / LN params: resident

    return pl.pallas_call(
        kernel,
        out_shape=jax.ShapeDtypeStruct((B, Lq, D), queries.dtype),
        grid=(B,),
        in_specs=[
            pl.BlockSpec((1, Lq, D), lambda b: (b, 0, 0)),     # queries
            pl.BlockSpec((1, Lkv, D), lambda b: (b, 0, 0)),    # keys_values
            pl.BlockSpec((1, D), const2),                      # ln_q gamma
            pl.BlockSpec((1, D), const2),                      # ln_q beta
            pl.BlockSpec((1, D), const2),                      # ln_kv gamma
            pl.BlockSpec((1, D), const2),                      # ln_kv beta
            pl.BlockSpec((D, D), const2),                      # wq_t (bf16)
            pl.BlockSpec((1, D), const2),                      # bq
            pl.BlockSpec((D, D), const2),                      # wk_t
            pl.BlockSpec((1, D), const2),                      # bk
            pl.BlockSpec((D, D), const2),                      # wv_t
            pl.BlockSpec((1, D), const2),                      # bv
            pl.BlockSpec((D, D), const2),                      # wo_t
            pl.BlockSpec((1, D), const2),                      # bo
        ],
        out_specs=pl.BlockSpec((1, Lq, D), lambda b: (b, 0, 0)),
        compiler_params=pltpu.CompilerParams(
            dimension_semantics=("parallel",)),
    )(queries, keys_values,
      params["ln_q_g"], params["ln_q_b"], params["ln_kv_g"], params["ln_kv_b"],
      params["wq_t"], params["bq"], params["wk_t"], params["bk"],
      params["wv_t"], params["bv"], params["wo_t"], params["bo"])


# ---------------------------- param init ----------------------------------- #

def _adjust_num_heads(hidden_size, num_heads):
    if hidden_size == 0:
        raise ValueError("hidden_size cannot be zero")
    if num_heads <= 0:
        num_heads = 1
    while hidden_size % num_heads != 0 and num_heads > 1:
        num_heads -= 1
    if hidden_size % num_heads != 0:
        num_heads = 1
    return num_heads


def init_params(key, hidden_size, num_heads=8):
    num_heads = _adjust_num_heads(hidden_size, num_heads)
    ks = jax.random.split(key, 4)

    def linear_params(k):
        w = 0.02 * jax.random.normal(k, (hidden_size, hidden_size), jnp.float32)
        # stored pre-transposed (in, out) and in bf16 (MXU-native operand dtype)
        return w.T.astype(jnp.bfloat16), jnp.zeros((1, hidden_size), jnp.float32)

    wq_t, bq = linear_params(ks[0])
    wk_t, bk = linear_params(ks[1])
    wv_t, bv = linear_params(ks[2])
    wo_t, bo = linear_params(ks[3])
    return dict(
        num_heads=num_heads,
        wq_t=wq_t, bq=bq, wk_t=wk_t, bk=bk, wv_t=wv_t, bv=bv, wo_t=wo_t, bo=bo,
        ln_q_g=jnp.ones((1, hidden_size), jnp.float32),
        ln_q_b=jnp.zeros((1, hidden_size), jnp.float32),
        ln_kv_g=jnp.ones((1, hidden_size), jnp.float32),
        ln_kv_b=jnp.zeros((1, hidden_size), jnp.float32),
    )


# ------------------------- plain-JAX reference ------------------------------ #

def _reference(params, queries, keys_values):
    def ln(x, g, b):
        mu = jnp.mean(x, -1, keepdims=True)
        var = jnp.mean((x - mu) ** 2, -1, keepdims=True)
        return (x - mu) / jnp.sqrt(var + _EPS) * g + b

    B, Lq, D = queries.shape
    Lkv = keys_values.shape[1]
    H = params["num_heads"]
    hd = D // H
    f32 = lambda a: a.astype(jnp.float32)

    qn = ln(queries, params["ln_q_g"], params["ln_q_b"])
    kvn = ln(keys_values, params["ln_kv_g"], params["ln_kv_b"])
    q = (qn @ f32(params["wq_t"]) + params["bq"]).reshape(B, Lq, H, hd).transpose(0, 2, 1, 3)
    k = (kvn @ f32(params["wk_t"]) + params["bk"]).reshape(B, Lkv, H, hd).transpose(0, 2, 1, 3)
    v = (kvn @ f32(params["wv_t"]) + params["bv"]).reshape(B, Lkv, H, hd).transpose(0, 2, 1, 3)
    s = jnp.einsum("bhqd,bhkd->bhqk", q, k) / math.sqrt(hd)
    p = jax.nn.softmax(s, axis=-1)
    o = jnp.einsum("bhqk,bhkd->bhqd", p, v)
    o = o.transpose(0, 2, 1, 3).reshape(B, Lq, D)
    return o @ f32(params["wo_t"]) + params["bo"]


# -------------------------------- main -------------------------------------- #

if __name__ == "__main__":
    batch, num_queries, seq_len_kv, hidden_size, num_heads = 2, 8, 16, 128, 8

    key = jax.random.PRNGKey(0)
    k_p, k_q, k_kv = jax.random.split(key, 3)

    params = init_params(k_p, hidden_size, num_heads)
    queries = jax.random.normal(k_q, (batch, num_queries, hidden_size), jnp.float32)
    keys_values = jax.random.normal(k_kv, (batch, seq_len_kv, hidden_size), jnp.float32)

    out = cross_attention_block(params, queries, keys_values)
    out = jax.block_until_ready(out)

    ref = _reference(params, queries, keys_values)
    assert out.shape == (batch, num_queries, hidden_size), out.shape
    max_err = float(jnp.max(jnp.abs(out - ref)))
    assert jnp.allclose(out, ref, atol=5e-3, rtol=5e-3), max_err

    print("KERNEL_OK")
</pallas_src>

<mosaic_0001>
module attributes {stable_mosaic.version = 11 : i64} {
  func.func @_fused_cab_kernel(%arg0: i32, %arg1: memref<1x8x128xf32, #tpu.memory_space<vmem>>, %arg2: memref<1x16x128xf32, #tpu.memory_space<vmem>>, %arg3: memref<1x128xf32, #tpu.memory_space<vmem>>, %arg4: memref<1x128xf32, #tpu.memory_space<vmem>>, %arg5: memref<1x128xf32, #tpu.memory_space<vmem>>, %arg6: memref<1x128xf32, #tpu.memory_space<vmem>>, %arg7: memref<128x128xbf16, #tpu.memory_space<vmem>>, %arg8: memref<1x128xf32, #tpu.memory_space<vmem>>, %arg9: memref<128x128xbf16, #tpu.memory_space<vmem>>, %arg10: memref<1x128xf32, #tpu.memory_space<vmem>>, %arg11: memref<128x128xbf16, #tpu.memory_space<vmem>>, %arg12: memref<1x128xf32, #tpu.memory_space<vmem>>, %arg13: memref<128x128xbf16, #tpu.memory_space<vmem>>, %arg14: memref<1x128xf32, #tpu.memory_space<vmem>>, %arg15: memref<1x8x128xf32, #tpu.memory_space<vmem>>) attributes {dimension_semantics = [#tpu.dimension_semantics<parallel>], iteration_bounds = array<i64: 2>, scalar_prefetch = 0 : i64, scratch_operands = 0 : i64, tpu.core_type = #tpu.core_type<tc>, window_params = [{transform_indices = @transform_0, window_bounds = array<i64: 1, 8, 128>}, {transform_indices = @transform_1, window_bounds = array<i64: 1, 16, 128>}, {pipeline_mode = #tpu.pipeline_mode<synchronous>, transform_indices = @transform_2, window_bounds = array<i64: 1, 128>}, {pipeline_mode = #tpu.pipeline_mode<synchronous>, transform_indices = @transform_3, window_bounds = array<i64: 1, 128>}, {pipeline_mode = #tpu.pipeline_mode<synchronous>, transform_indices = @transform_4, window_bounds = array<i64: 1, 128>}, {pipeline_mode = #tpu.pipeline_mode<synchronous>, transform_indices = @transform_5, window_bounds = array<i64: 1, 128>}, {pipeline_mode = #tpu.pipeline_mode<synchronous>, transform_indices = @transform_6, window_bounds = array<i64: 128, 128>}, {pipeline_mode = #tpu.pipeline_mode<synchronous>, transform_indices = @transform_7, window_bounds = array<i64: 1, 128>}, {pipeline_mode = #tpu.pipeline_mode<synchronous>, transform_indices = @transform_8, window_bounds = array<i64: 128, 128>}, {pipeline_mode = #tpu.pipeline_mode<synchronous>, transform_indices = @transform_9, window_bounds = array<i64: 1, 128>}, {pipeline_mode = #tpu.pipeline_mode<synchronous>, transform_indices = @transform_10, window_bounds = array<i64: 128, 128>}, {pipeline_mode = #tpu.pipeline_mode<synchronous>, transform_indices = @transform_11, window_bounds = array<i64: 1, 128>}, {pipeline_mode = #tpu.pipeline_mode<synchronous>, transform_indices = @transform_12, window_bounds = array<i64: 128, 128>}, {pipeline_mode = #tpu.pipeline_mode<synchronous>, transform_indices = @transform_13, window_bounds = array<i64: 1, 128>}, {transform_indices = @transform_14, window_bounds = array<i64: 1, 8, 128>}]} {
    %c0 = arith.constant 0 : index
    %c0_0 = arith.constant 0 : index
    %c0_1 = arith.constant 0 : index
    %0 = vector.load %arg1[%c0, %c0_0, %c0_1] : memref<1x8x128xf32, #tpu.memory_space<vmem>>, vector<1x8x128xf32>
    %1 = vector.shape_cast %0 : vector<1x8x128xf32> to vector<8x128xf32>
    %c0_2 = arith.constant 0 : index
    %c0_3 = arith.constant 0 : index
    %2 = vector.load %arg3[%c0_2, %c0_3] : memref<1x128xf32, #tpu.memory_space<vmem>>, vector<1x128xf32>
    %c0_4 = arith.constant 0 : index
    %c0_5 = arith.constant 0 : index
    %3 = vector.load %arg4[%c0_4, %c0_5] : memref<1x128xf32, #tpu.memory_space<vmem>>, vector<1x128xf32>
    %cst = arith.constant dense<0.000000e+00> : vector<8xf32>
    %4 = vector.multi_reduction <add>, %1, %cst [1] : vector<8x128xf32> to vector<8xf32>
    %5 = vector.shape_cast %4 : vector<8xf32> to vector<8x1xf32>
    %cst_6 = arith.constant 1.280000e+02 : f32
    %6 = vector.broadcast %cst_6 : f32 to vector<8x1xf32>
    %7 = arith.divf %5, %6 : vector<8x1xf32>
    %8 = vector.broadcast %7 : vector<8x1xf32> to vector<8x128xf32>
    %9 = arith.subf %1, %8 : vector<8x128xf32>
    %10 = arith.mulf %9, %9 : vector<8x128xf32>
    %cst_7 = arith.constant dense<0.000000e+00> : vector<8xf32>
    %11 = vector.multi_reduction <add>, %10, %cst_7 [1] : vector<8x128xf32> to vector<8xf32>
    %12 = vector.shape_cast %11 : vector<8xf32> to vector<8x1xf32>
    %cst_8 = arith.constant 1.280000e+02 : f32
    %13 = vector.broadcast %cst_8 : f32 to vector<8x1xf32>
    %14 = arith.divf %12, %13 : vector<8x1xf32>
    %cst_9 = arith.constant 9.99999997E-7 : f32
    %15 = vector.broadcast %cst_9 : f32 to vector<8x1xf32>
    %16 = arith.addf %14, %15 : vector<8x1xf32>
    %17 = math.rsqrt %16 : vector<8x1xf32>
    %18 = vector.broadcast %17 : vector<8x1xf32> to vector<8x128xf32>
    %19 = arith.mulf %9, %18 : vector<8x128xf32>
    %20 = vector.broadcast %2 : vector<1x128xf32> to vector<8x128xf32>
    %21 = arith.mulf %19, %20 : vector<8x128xf32>
    %22 = vector.broadcast %3 : vector<1x128xf32> to vector<8x128xf32>
    %23 = arith.addf %21, %22 : vector<8x128xf32>
    %c0_10 = arith.constant 0 : index
    %c0_11 = arith.constant 0 : index
    %c0_12 = arith.constant 0 : index
    %24 = vector.load %arg2[%c0_10, %c0_11, %c0_12] : memref<1x16x128xf32, #tpu.memory_space<vmem>>, vector<1x16x128xf32>
    %25 = vector.shape_cast %24 : vector<1x16x128xf32> to vector<16x128xf32>
    %c0_13 = arith.constant 0 : index
    %c0_14 = arith.constant 0 : index
    %26 = vector.load %arg5[%c0_13, %c0_14] : memref<1x128xf32, #tpu.memory_space<vmem>>, vector<1x128xf32>
    %c0_15 = arith.constant 0 : index
    %c0_16 = arith.constant 0 : index
    %27 = vector.load %arg6[%c0_15, %c0_16] : memref<1x128xf32, #tpu.memory_space<vmem>>, vector<1x128xf32>
    %cst_17 = arith.constant dense<0.000000e+00> : vector<16xf32>
    %28 = vector.multi_reduction <add>, %25, %cst_17 [1] : vector<16x128xf32> to vector<16xf32>
    %29 = vector.shape_cast %28 : vector<16xf32> to vector<16x1xf32>
    %cst_18 = arith.constant 1.280000e+02 : f32
    %30 = vector.broadcast %cst_18 : f32 to vector<16x1xf32>
    %31 = arith.divf %29, %30 : vector<16x1xf32>
    %32 = vector.broadcast %31 : vector<16x1xf32> to vector<16x128xf32>
    %33 = arith.subf %25, %32 : vector<16x128xf32>
    %34 = arith.mulf %33, %33 : vector<16x128xf32>
    %cst_19 = arith.constant dense<0.000000e+00> : vector<16xf32>
    %35 = vector.multi_reduction <add>, %34, %cst_19 [1] : vector<16x128xf32> to vector<16xf32>
    %36 = vector.shape_cast %35 : vector<16xf32> to vector<16x1xf32>
    %cst_20 = arith.constant 1.280000e+02 : f32
    %37 = vector.broadcast %cst_20 : f32 to vector<16x1xf32>
    %38 = arith.divf %36, %37 : vector<16x1xf32>
    %cst_21 = arith.constant 9.99999997E-7 : f32
    %39 = vector.broadcast %cst_21 : f32 to vector<16x1xf32>
    %40 = arith.addf %38, %39 : vector<16x1xf32>
    %41 = math.rsqrt %40 : vector<16x1xf32>
    %42 = vector.broadcast %41 : vector<16x1xf32> to vector<16x128xf32>
    %43 = arith.mulf %33, %42 : vector<16x128xf32>
    %44 = vector.broadcast %26 : vector<1x128xf32> to vector<16x128xf32>
    %45 = arith.mulf %43, %44 : vector<16x128xf32>
    %46 = vector.broadcast %27 : vector<1x128xf32> to vector<16x128xf32>
    %47 = arith.addf %45, %46 : vector<16x128xf32>
    %48 = arith.truncf %23 : vector<8x128xf32> to vector<8x128xbf16>
    %49 = arith.truncf %47 : vector<16x128xf32> to vector<16x128xbf16>
    %c0_22 = arith.constant 0 : index
    %c0_23 = arith.constant 0 : index
    %50 = vector.load %arg7[%c0_22, %c0_23] : memref<128x128xbf16, #tpu.memory_space<vmem>>, vector<128x128xbf16>
    %cst_24 = arith.constant dense<0.000000e+00> : vector<8x128xf32>
    %51 = tpu.matmul %48, %50, %cst_24 {dimension_numbers = #tpu.dot_dimension_numbers<[1], [0], [0], [1], [0, 0, 1, 1], [], []>} : vector<8x128xbf16>, vector<128x128xbf16>, vector<8x128xf32> -> vector<8x128xf32>
    %c0_25 = arith.constant 0 : index
    %c0_26 = arith.constant 0 : index
    %52 = vector.load %arg8[%c0_25, %c0_26] : memref<1x128xf32, #tpu.memory_space<vmem>>, vector<1x128xf32>
    %53 = vector.broadcast %52 : vector<1x128xf32> to vector<8x128xf32>
    %54 = arith.addf %51, %53 : vector<8x128xf32>
    %55 = arith.truncf %54 : vector<8x128xf32> to vector<8x128xbf16>
    %c0_27 = arith.constant 0 : index
    %c0_28 = arith.constant 0 : index
    %56 = vector.load %arg9[%c0_27, %c0_28] : memref<128x128xbf16, #tpu.memory_space<vmem>>, vector<128x128xbf16>
    %cst_29 = arith.constant dense<0.000000e+00> : vector<16x128xf32>
    %57 = tpu.matmul %49, %56, %cst_29 {dimension_numbers = #tpu.dot_dimension_numbers<[1], [0], [0], [1], [0, 0, 1, 1], [], []>} : vector<16x128xbf16>, vector<128x128xbf16>, vector<16x128xf32> -> vector<16x128xf32>
    %c0_30 = arith.constant 0 : index
    %c0_31 = arith.constant 0 : index
    %58 = vector.load %arg10[%c0_30, %c0_31] : memref<1x128xf32, #tpu.memory_space<vmem>>, vector<1x128xf32>
    %59 = vector.broadcast %58 : vector<1x128xf32> to vector<16x128xf32>
    %60 = arith.addf %57, %59 : vector<16x128xf32>
    %61 = arith.truncf %60 : vector<16x128xf32> to vector<16x128xbf16>
    %c0_32 = arith.constant 0 : index
    %c0_33 = arith.constant 0 : index
    %62 = vector.load %arg11[%c0_32, %c0_33] : memref<128x128xbf16, #tpu.memory_space<vmem>>, vector<128x128xbf16>
    %cst_34 = arith.constant dense<0.000000e+00> : vector<16x128xf32>
    %63 = tpu.matmul %49, %62, %cst_34 {dimension_numbers = #tpu.dot_dimension_numbers<[1], [0], [0], [1], [0, 0, 1, 1], [], []>} : vector<16x128xbf16>, vector<128x128xbf16>, vector<16x128xf32> -> vector<16x128xf32>
    %c0_35 = arith.constant 0 : index
    %c0_36 = arith.constant 0 : index
    %64 = vector.load %arg12[%c0_35, %c0_36] : memref<1x128xf32, #tpu.memory_space<vmem>>, vector<1x128xf32>
    %65 = vector.broadcast %64 : vector<1x128xf32> to vector<16x128xf32>
    %66 = arith.addf %63, %65 : vector<16x128xf32>
    %67 = arith.truncf %66 : vector<16x128xf32> to vector<16x128xbf16>
    %c0_37 = arith.constant 0 : index
    %c0_38 = arith.constant 0 : index
    %68 = vector.load %arg13[%c0_37, %c0_38] : memref<128x128xbf16, #tpu.memory_space<vmem>>, vector<128x128xbf16>
    %cst_39 = arith.constant 0.000000e+00 : f32
    %69 = vector.broadcast %cst_39 : f32 to vector<8x128xf32>
    %70 = vector.extract_strided_slice %55 {offsets = [0, 0], sizes = [8, 16], strides = [1, 1]} : vector<8x128xbf16> to vector<8x16xbf16>
    %71 = vector.extract_strided_slice %61 {offsets = [0, 0], sizes = [16, 16], strides = [1, 1]} : vector<16x128xbf16> to vector<16x16xbf16>
    %72 = vector.extract_strided_slice %67 {offsets = [0, 0], sizes = [16, 16], strides = [1, 1]} : vector<16x128xbf16> to vector<16x16xbf16>
    %cst_40 = arith.constant dense<0.000000e+00> : vector<8x16xf32>
    %73 = tpu.matmul %70, %71, %cst_40 {dimension_numbers = #tpu.dot_dimension_numbers<[1], [1], [0], [0], [0, 0, 1, 0], [], []>} : vector<8x16xbf16>, vector<16x16xbf16>, vector<8x16xf32> -> vector<8x16xf32>
    %cst_41 = arith.constant 2.500000e-01 : f32
    %74 = vector.broadcast %cst_41 : f32 to vector<8x16xf32>
    %75 = arith.mulf %73, %74 : vector<8x16xf32>
    %cst_42 = arith.constant dense<0xFF800000> : vector<8xf32>
    %76 = vector.multi_reduction <maximumf>, %75, %cst_42 [1] : vector<8x16xf32> to vector<8xf32>
    %77 = vector.shape_cast %76 : vector<8xf32> to vector<8x1xf32>
    %78 = vector.broadcast %77 : vector<8x1xf32> to vector<8x16xf32>
    %79 = arith.subf %75, %78 : vector<8x16xf32>
    %80 = math.exp %79 : vector<8x16xf32>
    %cst_43 = arith.constant dense<0.000000e+00> : vector<8xf32>
    %81 = vector.multi_reduction <add>, %80, %cst_43 [1] : vector<8x16xf32> to vector<8xf32>
    %82 = vector.shape_cast %81 : vector<8xf32> to vector<8x1xf32>
    %83 = tpu.reciprocal %82 {approx = true} : vector<8x1xf32> -> vector<8x1xf32>
    %84 = arith.truncf %80 : vector<8x16xf32> to vector<8x16xbf16>
    %cst_44 = arith.constant dense<0.000000e+00> : vector<8x16xf32>
    %85 = tpu.matmul %84, %72, %cst_44 {dimension_numbers = #tpu.dot_dimension_numbers<[1], [0], [0], [1], [0, 0, 1, 1], [], []>} : vector<8x16xbf16>, vector<16x16xbf16>, vector<8x16xf32> -> vector<8x16xf32>
    %86 = vector.broadcast %83 : vector<8x1xf32> to vector<8x16xf32>
    %87 = arith.mulf %85, %86 : vector<8x16xf32>
    %88 = arith.truncf %87 : vector<8x16xf32> to vector<8x16xbf16>
    %89 = vector.extract_strided_slice %68 {offsets = [0, 0], sizes = [16, 128], strides = [1, 1]} : vector<128x128xbf16> to vector<16x128xbf16>
    %cst_45 = arith.constant dense<0.000000e+00> : vector<8x128xf32>
    %90 = tpu.matmul %88, %89, %cst_45 {dimension_numbers = #tpu.dot_dimension_numbers<[1], [0], [0], [1], [0, 0, 1, 1], [], []>} : vector<8x16xbf16>, vector<16x128xbf16>, vector<8x128xf32> -> vector<8x128xf32>
    %91 = arith.addf %69, %90 : vector<8x128xf32>
    %92 = vector.extract_strided_slice %55 {offsets = [0, 16], sizes = [8, 16], strides = [1, 1]} : vector<8x128xbf16> to vector<8x16xbf16>
    %93 = vector.extract_strided_slice %61 {offsets = [0, 16], sizes = [16, 16], strides = [1, 1]} : vector<16x128xbf16> to vector<16x16xbf16>
    %94 = vector.extract_strided_slice %67 {offsets = [0, 16], sizes = [16, 16], strides = [1, 1]} : vector<16x128xbf16> to vector<16x16xbf16>
    %cst_46 = arith.constant dense<0.000000e+00> : vector<8x16xf32>
    %95 = tpu.matmul %92, %93, %cst_46 {dimension_numbers = #tpu.dot_dimension_numbers<[1], [1], [0], [0], [0, 0, 1, 0], [], []>} : vector<8x16xbf16>, vector<16x16xbf16>, vector<8x16xf32> -> vector<8x16xf32>
    %cst_47 = arith.constant 2.500000e-01 : f32
    %96 = vector.broadcast %cst_47 : f32 to vector<8x16xf32>
    %97 = arith.mulf %95, %96 : vector<8x16xf32>
    %cst_48 = arith.constant dense<0xFF800000> : vector<8xf32>
    %98 = vector.multi_reduction <maximumf>, %97, %cst_48 [1] : vector<8x16xf32> to vector<8xf32>
    %99 = vector.shape_cast %98 : vector<8xf32> to vector<8x1xf32>
    %100 = vector.broadcast %99 : vector<8x1xf32> to vector<8x16xf32>
    %101 = arith.subf %97, %100 : vector<8x16xf32>
    %102 = math.exp %101 : vector<8x16xf32>
    %cst_49 = arith.constant dense<0.000000e+00> : vector<8xf32>
    %103 = vector.multi_reduction <add>, %102, %cst_49 [1] : vector<8x16xf32> to vector<8xf32>
    %104 = vector.shape_cast %103 : vector<8xf32> to vector<8x1xf32>
    %105 = tpu.reciprocal %104 {approx = true} : vector<8x1xf32> -> vector<8x1xf32>
    %106 = arith.truncf %102 : vector<8x16xf32> to vector<8x16xbf16>
    %cst_50 = arith.constant dense<0.000000e+00> : vector<8x16xf32>
    %107 = tpu.matmul %106, %94, %cst_50 {dimension_numbers = #tpu.dot_dimension_numbers<[1], [0], [0], [1], [0, 0, 1, 1], [], []>} : vector<8x16xbf16>, vector<16x16xbf16>, vector<8x16xf32> -> vector<8x16xf32>
    %108 = vector.broadcast %105 : vector<8x1xf32> to vector<8x16xf32>
    %109 = arith.mulf %107, %108 : vector<8x16xf32>
    %110 = arith.truncf %109 : vector<8x16xf32> to vector<8x16xbf16>
    %111 = vector.extract_strided_slice %68 {offsets = [16, 0], sizes = [16, 128], strides = [1, 1]} : vector<128x128xbf16> to vector<16x128xbf16>
    %cst_51 = arith.constant dense<0.000000e+00> : vector<8x128xf32>
    %112 = tpu.matmul %110, %111, %cst_51 {dimension_numbers = #tpu.dot_dimension_numbers<[1], [0], [0], [1], [0, 0, 1, 1], [], []>} : vector<8x16xbf16>, vector<16x128xbf16>, vector<8x128xf32> -> vector<8x128xf32>
    %113 = arith.addf %91, %112 : vector<8x128xf32>
    %114 = vector.extract_strided_slice %55 {offsets = [0, 32], sizes = [8, 16], strides = [1, 1]} : vector<8x128xbf16> to vector<8x16xbf16>
    %115 = vector.extract_strided_slice %61 {offsets = [0, 32], sizes = [16, 16], strides = [1, 1]} : vector<16x128xbf16> to vector<16x16xbf16>
    %116 = vector.extract_strided_slice %67 {offsets = [0, 32], sizes = [16, 16], strides = [1, 1]} : vector<16x128xbf16> to vector<16x16xbf16>
    %cst_52 = arith.constant dense<0.000000e+00> : vector<8x16xf32>
    %117 = tpu.matmul %114, %115, %cst_52 {dimension_numbers = #tpu.dot_dimension_numbers<[1], [1], [0], [0], [0, 0, 1, 0], [], []>} : vector<8x16xbf16>, vector<16x16xbf16>, vector<8x16xf32> -> vector<8x16xf32>
    %cst_53 = arith.constant 2.500000e-01 : f32
    %118 = vector.broadcast %cst_53 : f32 to vector<8x16xf32>
    %119 = arith.mulf %117, %118 : vector<8x16xf32>
    %cst_54 = arith.constant dense<0xFF800000> : vector<8xf32>
    %120 = vector.multi_reduction <maximumf>, %119, %cst_54 [1] : vector<8x16xf32> to vector<8xf32>
    %121 = vector.shape_cast %120 : vector<8xf32> to vector<8x1xf32>
    %122 = vector.broadcast %121 : vector<8x1xf32> to vector<8x16xf32>
    %123 = arith.subf %119, %122 : vector<8x16xf32>
    %124 = math.exp %123 : vector<8x16xf32>
    %cst_55 = arith.constant dense<0.000000e+00> : vector<8xf32>
    %125 = vector.multi_reduction <add>, %124, %cst_55 [1] : vector<8x16xf32> to vector<8xf32>
    %126 = vector.shape_cast %125 : vector<8xf32> to vector<8x1xf32>
    %127 = tpu.reciprocal %126 {approx = true} : vector<8x1xf32> -> vector<8x1xf32>
    %128 = arith.truncf %124 : vector<8x16xf32> to vector<8x16xbf16>
    %cst_56 = arith.constant dense<0.000000e+00> : vector<8x16xf32>
    %129 = tpu.matmul %128, %116, %cst_56 {dimension_numbers = #tpu.dot_dimension_numbers<[1], [0], [0], [1], [0, 0, 1, 1], [], []>} : vector<8x16xbf16>, vector<16x16xbf16>, vector<8x16xf32> -> vector<8x16xf32>
    %130 = vector.broadcast %127 : vector<8x1xf32> to vector<8x16xf32>
    %131 = arith.mulf %129, %130 : vector<8x16xf32>
    %132 = arith.truncf %131 : vector<8x16xf32> to vector<8x16xbf16>
    %133 = vector.extract_strided_slice %68 {offsets = [32, 0], sizes = [16, 128], strides = [1, 1]} : vector<128x128xbf16> to vector<16x128xbf16>
    %cst_57 = arith.constant dense<0.000000e+00> : vector<8x128xf32>
    %134 = tpu.matmul %132, %133, %cst_57 {dimension_numbers = #tpu.dot_dimension_numbers<[1], [0], [0], [1], [0, 0, 1, 1], [], []>} : vector<8x16xbf16>, vector<16x128xbf16>, vector<8x128xf32> -> vector<8x128xf32>
    %135 = arith.addf %113, %134 : vector<8x128xf32>
    %136 = vector.extract_strided_slice %55 {offsets = [0, 48], sizes = [8, 16], strides = [1, 1]} : vector<8x128xbf16> to vector<8x16xbf16>
    %137 = vector.extract_strided_slice %61 {offsets = [0, 48], sizes = [16, 16], strides = [1, 1]} : vector<16x128xbf16> to vector<16x16xbf16>
    %138 = vector.extract_strided_slice %67 {offsets = [0, 48], sizes = [16, 16], strides = [1, 1]} : vector<16x128xbf16> to vector<16x16xbf16>
    %cst_58 = arith.constant dense<0.000000e+00> : vector<8x16xf32>
    %139 = tpu.matmul %136, %137, %cst_58 {dimension_numbers = #tpu.dot_dimension_numbers<[1], [1], [0], [0], [0, 0, 1, 0], [], []>} : vector<8x16xbf16>, vector<16x16xbf16>, vector<8x16xf32> -> vector<8x16xf32>
    %cst_59 = arith.constant 2.500000e-01 : f32
    %140 = vector.broadcast %cst_59 : f32 to vector<8x16xf32>
    %141 = arith.mulf %139, %140 : vector<8x16xf32>
    %cst_60 = arith.constant dense<0xFF800000> : vector<8xf32>
    %142 = vector.multi_reduction <maximumf>, %141, %cst_60 [1] : vector<8x16xf32> to vector<8xf32>
    %143 = vector.shape_cast %142 : vector<8xf32> to vector<8x1xf32>
    %144 = vector.broadcast %143 : vector<8x1xf32> to vector<8x16xf32>
    %145 = arith.subf %141, %144 : vector<8x16xf32>
    %146 = math.exp %145 : vector<8x16xf32>
    %cst_61 = arith.constant dense<0.000000e+00> : vector<8xf32>
    %147 = vector.multi_reduction <add>, %146, %cst_61 [1] : vector<8x16xf32> to vector<8xf32>
    %148 = vector.shape_cast %147 : vector<8xf32> to vector<8x1xf32>
    %149 = tpu.reciprocal %148 {approx = true} : vector<8x1xf32> -> vector<8x1xf32>
    %150 = arith.truncf %146 : vector<8x16xf32> to vector<8x16xbf16>
    %cst_62 = arith.constant dense<0.000000e+00> : vector<8x16xf32>
    %151 = tpu.matmul %150, %138, %cst_62 {dimension_numbers = #tpu.dot_dimension_numbers<[1], [0], [0], [1], [0, 0, 1, 1], [], []>} : vector<8x16xbf16>, vector<16x16xbf16>, vector<8x16xf32> -> vector<8x16xf32>
    %152 = vector.broadcast %149 : vector<8x1xf32> to vector<8x16xf32>
    %153 = arith.mulf %151, %152 : vector<8x16xf32>
    %154 = arith.truncf %153 : vector<8x16xf32> to vector<8x16xbf16>
    %155 = vector.extract_strided_slice %68 {offsets = [48, 0], sizes = [16, 128], strides = [1, 1]} : vector<128x128xbf16> to vector<16x128xbf16>
    %cst_63 = arith.constant dense<0.000000e+00> : vector<8x128xf32>
    %156 = tpu.matmul %154, %155, %cst_63 {dimension_numbers = #tpu.dot_dimension_numbers<[1], [0], [0], [1], [0, 0, 1, 1], [], []>} : vector<8x16xbf16>, vector<16x128xbf16>, vector<8x128xf32> -> vector<8x128xf32>
    %157 = arith.addf %135, %156 : vector<8x128xf32>
    %158 = vector.extract_strided_slice %55 {offsets = [0, 64], sizes = [8, 16], strides = [1, 1]} : vector<8x128xbf16> to vector<8x16xbf16>
    %159 = vector.extract_strided_slice %61 {offsets = [0, 64], sizes = [16, 16], strides = [1, 1]} : vector<16x128xbf16> to vector<16x16xbf16>
    %160 = vector.extract_strided_slice %67 {offsets = [0, 64], sizes = [16, 16], strides = [1, 1]} : vector<16x128xbf16> to vector<16x16xbf16>
    %cst_64 = arith.constant dense<0.000000e+00> : vector<8x16xf32>
    %161 = tpu.matmul %158, %159, %cst_64 {dimension_numbers = #tpu.dot_dimension_numbers<[1], [1], [0], [0], [0, 0, 1, 0], [], []>} : vector<8x16xbf16>, vector<16x16xbf16>, vector<8x16xf32> -> vector<8x16xf32>
    %cst_65 = arith.constant 2.500000e-01 : f32
    %162 = vector.broadcast %cst_65 : f32 to vector<8x16xf32>
    %163 = arith.mulf %161, %162 : vector<8x16xf32>
    %cst_66 = arith.constant dense<0xFF800000> : vector<8xf32>
    %164 = vector.multi_reduction <maximumf>, %163, %cst_66 [1] : vector<8x16xf32> to vector<8xf32>
    %165 = vector.shape_cast %164 : vector<8xf32> to vector<8x1xf32>
    %166 = vector.broadcast %165 : vector<8x1xf32> to vector<8x16xf32>
    %167 = arith.subf %163, %166 : vector<8x16xf32>
    %168 = math.exp %167 : vector<8x16xf32>
    %cst_67 = arith.constant dense<0.000000e+00> : vector<8xf32>
    %169 = vector.multi_reduction <add>, %168, %cst_67 [1] : vector<8x16xf32> to vector<8xf32>
    %170 = vector.shape_cast %169 : vector<8xf32> to vector<8x1xf32>
    %171 = tpu.reciprocal %170 {approx = true} : vector<8x1xf32> -> vector<8x1xf32>
    %172 = arith.truncf %168 : vector<8x16xf32> to vector<8x16xbf16>
    %cst_68 = arith.constant dense<0.000000e+00> : vector<8x16xf32>
    %173 = tpu.matmul %172, %160, %cst_68 {dimension_numbers = #tpu.dot_dimension_numbers<[1], [0], [0], [1], [0, 0, 1, 1], [], []>} : vector<8x16xbf16>, vector<16x16xbf16>, vector<8x16xf32> -> vector<8x16xf32>
    %174 = vector.broadcast %171 : vector<8x1xf32> to vector<8x16xf32>
    %175 = arith.mulf %173, %174 : vector<8x16xf32>
    %176 = arith.truncf %175 : vector<8x16xf32> to vector<8x16xbf16>
    %177 = vector.extract_strided_slice %68 {offsets = [64, 0], sizes = [16, 128], strides = [1, 1]} : vector<128x128xbf16> to vector<16x128xbf16>
    %cst_69 = arith.constant dense<0.000000e+00> : vector<8x128xf32>
    %178 = tpu.matmul %176, %177, %cst_69 {dimension_numbers = #tpu.dot_dimension_numbers<[1], [0], [0], [1], [0, 0, 1, 1], [], []>} : vector<8x16xbf16>, vector<16x128xbf16>, vector<8x128xf32> -> vector<8x128xf32>
    %179 = arith.addf %157, %178 : vector<8x128xf32>
    %180 = vector.extract_strided_slice %55 {offsets = [0, 80], sizes = [8, 16], strides = [1, 1]} : vector<8x128xbf16> to vector<8x16xbf16>
    %181 = vector.extract_strided_slice %61 {offsets = [0, 80], sizes = [16, 16], strides = [1, 1]} : vector<16x128xbf16> to vector<16x16xbf16>
    %182 = vector.extract_strided_slice %67 {offsets = [0, 80], sizes = [16, 16], strides = [1, 1]} : vector<16x128xbf16> to vector<16x16xbf16>
    %cst_70 = arith.constant dense<0.000000e+00> : vector<8x16xf32>
    %183 = tpu.matmul %180, %181, %cst_70 {dimension_numbers = #tpu.dot_dimension_numbers<[1], [1], [0], [0], [0, 0, 1, 0], [], []>} : vector<8x16xbf16>, vector<16x16xbf16>, vector<8x16xf32> -> vector<8x16xf32>
    %cst_71 = arith.constant 2.500000e-01 : f32
    %184 = vector.broadcast %cst_71 : f32 to vector<8x16xf32>
    %185 = arith.mulf %183, %184 : vector<8x16xf32>
    %cst_72 = arith.constant dense<0xFF800000> : vector<8xf32>
    %186 = vector.multi_reduction <maximumf>, %185, %cst_72 [1] : vector<8x16xf32> to vector<8xf32>
    %187 = vector.shape_cast %186 : vector<8xf32> to vector<8x1xf32>
    %188 = vector.broadcast %187 : vector<8x1xf32> to vector<8x16xf32>
    %189 = arith.subf %185, %188 : vector<8x16xf32>
    %190 = math.exp %189 : vector<8x16xf32>
    %cst_73 = arith.constant dense<0.000000e+00> : vector<8xf32>
    %191 = vector.multi_reduction <add>, %190, %cst_73 [1] : vector<8x16xf32> to vector<8xf32>
    %192 = vector.shape_cast %191 : vector<8xf32> to vector<8x1xf32>
    %193 = tpu.reciprocal %192 {approx = true} : vector<8x1xf32> -> vector<8x1xf32>
    %194 = arith.truncf %190 : vector<8x16xf32> to vector<8x16xbf16>
    %cst_74 = arith.constant dense<0.000000e+00> : vector<8x16xf32>
    %195 = tpu.matmul %194, %182, %cst_74 {dimension_numbers = #tpu.dot_dimension_numbers<[1], [0], [0], [1], [0, 0, 1, 1], [], []>} : vector<8x16xbf16>, vector<16x16xbf16>, vector<8x16xf32> -> vector<8x16xf32>
    %196 = vector.broadcast %193 : vector<8x1xf32> to vector<8x16xf32>
    %197 = arith.mulf %195, %196 : vector<8x16xf32>
    %198 = arith.truncf %197 : vector<8x16xf32> to vector<8x16xbf16>
    %199 = vector.extract_strided_slice %68 {offsets = [80, 0], sizes = [16, 128], strides = [1, 1]} : vector<128x128xbf16> to vector<16x128xbf16>
    %cst_75 = arith.constant dense<0.000000e+00> : vector<8x128xf32>
    %200 = tpu.matmul %198, %199, %cst_75 {dimension_numbers = #tpu.dot_dimension_numbers<[1], [0], [0], [1], [0, 0, 1, 1], [], []>} : vector<8x16xbf16>, vector<16x128xbf16>, vector<8x128xf32> -> vector<8x128xf32>
    %201 = arith.addf %179, %200 : vector<8x128xf32>
    %202 = vector.extract_strided_slice %55 {offsets = [0, 96], sizes = [8, 16], strides = [1, 1]} : vector<8x128xbf16> to vector<8x16xbf16>
    %203 = vector.extract_strided_slice %61 {offsets = [0, 96], sizes = [16, 16], strides = [1, 1]} : vector<16x128xbf16> to vector<16x16xbf16>
    %204 = vector.extract_strided_slice %67 {offsets = [0, 96], sizes = [16, 16], strides = [1, 1]} : vector<16x128xbf16> to vector<16x16xbf16>
    %cst_76 = arith.constant dense<0.000000e+00> : vector<8x16xf32>
    %205 = tpu.matmul %202, %203, %cst_76 {dimension_numbers = #tpu.dot_dimension_numbers<[1], [1], [0], [0], [0, 0, 1, 0], [], []>} : vector<8x16xbf16>, vector<16x16xbf16>, vector<8x16xf32> -> vector<8x16xf32>
    %cst_77 = arith.constant 2.500000e-01 : f32
    %206 = vector.broadcast %cst_77 : f32 to vector<8x16xf32>
    %207 = arith.mulf %205, %206 : vector<8x16xf32>
    %cst_78 = arith.constant dense<0xFF800000> : vector<8xf32>
    %208 = vector.multi_reduction <maximumf>, %207, %cst_78 [1] : vector<8x16xf32> to vector<8xf32>
    %209 = vector.shape_cast %208 : vector<8xf32> to vector<8x1xf32>
    %210 = vector.broadcast %209 : vector<8x1xf32> to vector<8x16xf32>
    %211 = arith.subf %207, %210 : vector<8x16xf32>
    %212 = math.exp %211 : vector<8x16xf32>
    %cst_79 = arith.constant dense<0.000000e+00> : vector<8xf32>
    %213 = vector.multi_reduction <add>, %212, %cst_79 [1] : vector<8x16xf32> to vector<8xf32>
    %214 = vector.shape_cast %213 : vector<8xf32> to vector<8x1xf32>
    %215 = tpu.reciprocal %214 {approx = true} : vector<8x1xf32> -> vector<8x1xf32>
    %216 = arith.truncf %212 : vector<8x16xf32> to vector<8x16xbf16>
    %cst_80 = arith.constant dense<0.000000e+00> : vector<8x16xf32>
    %217 = tpu.matmul %216, %204, %cst_80 {dimension_numbers = #tpu.dot_dimension_numbers<[1], [0], [0], [1], [0, 0, 1, 1], [], []>} : vector<8x16xbf16>, vector<16x16xbf16>, vector<8x16xf32> -> vector<8x16xf32>
    %218 = vector.broadcast %215 : vector<8x1xf32> to vector<8x16xf32>
    %219 = arith.mulf %217, %218 : vector<8x16xf32>
    %220 = arith.truncf %219 : vector<8x16xf32> to vector<8x16xbf16>
    %221 = vector.extract_strided_slice %68 {offsets = [96, 0], sizes = [16, 128], strides = [1, 1]} : vector<128x128xbf16> to vector<16x128xbf16>
    %cst_81 = arith.constant dense<0.000000e+00> : vector<8x128xf32>
    %222 = tpu.matmul %220, %221, %cst_81 {dimension_numbers = #tpu.dot_dimension_numbers<[1], [0], [0], [1], [0, 0, 1, 1], [], []>} : vector<8x16xbf16>, vector<16x128xbf16>, vector<8x128xf32> -> vector<8x128xf32>
    %223 = arith.addf %201, %222 : vector<8x128xf32>
    %224 = vector.extract_strided_slice %55 {offsets = [0, 112], sizes = [8, 16], strides = [1, 1]} : vector<8x128xbf16> to vector<8x16xbf16>
    %225 = vector.extract_strided_slice %61 {offsets = [0, 112], sizes = [16, 16], strides = [1, 1]} : vector<16x128xbf16> to vector<16x16xbf16>
    %226 = vector.extract_strided_slice %67 {offsets = [0, 112], sizes = [16, 16], strides = [1, 1]} : vector<16x128xbf16> to vector<16x16xbf16>
    %cst_82 = arith.constant dense<0.000000e+00> : vector<8x16xf32>
    %227 = tpu.matmul %224, %225, %cst_82 {dimension_numbers = #tpu.dot_dimension_numbers<[1], [1], [0], [0], [0, 0, 1, 0], [], []>} : vector<8x16xbf16>, vector<16x16xbf16>, vector<8x16xf32> -> vector<8x16xf32>
    %cst_83 = arith.constant 2.500000e-01 : f32
    %228 = vector.broadcast %cst_83 : f32 to vector<8x16xf32>
    %229 = arith.mulf %227, %228 : vector<8x16xf32>
    %cst_84 = arith.constant dense<0xFF800000> : vector<8xf32>
    %230 = vector.multi_reduction <maximumf>, %229, %cst_84 [1] : vector<8x16xf32> to vector<8xf32>
    %231 = vector.shape_cast %230 : vector<8xf32> to vector<8x1xf32>
    %232 = vector.broadcast %231 : vector<8x1xf32> to vector<8x16xf32>
    %233 = arith.subf %229, %232 : vector<8x16xf32>
    %234 = math.exp %233 : vector<8x16xf32>
    %cst_85 = arith.constant dense<0.000000e+00> : vector<8xf32>
    %235 = vector.multi_reduction <add>, %234, %cst_85 [1] : vector<8x16xf32> to vector<8xf32>
    %236 = vector.shape_cast %235 : vector<8xf32> to vector<8x1xf32>
    %237 = tpu.reciprocal %236 {approx = true} : vector<8x1xf32> -> vector<8x1xf32>
    %238 = arith.truncf %234 : vector<8x16xf32> to vector<8x16xbf16>
    %cst_86 = arith.constant dense<0.000000e+00> : vector<8x16xf32>
    %239 = tpu.matmul %238, %226, %cst_86 {dimension_numbers = #tpu.dot_dimension_numbers<[1], [0], [0], [1], [0, 0, 1, 1], [], []>} : vector<8x16xbf16>, vector<16x16xbf16>, vector<8x16xf32> -> vector<8x16xf32>
    %240 = vector.broadcast %237 : vector<8x1xf32> to vector<8x16xf32>
    %241 = arith.mulf %239, %240 : vector<8x16xf32>
    %242 = arith.truncf %241 : vector<8x16xf32> to vector<8x16xbf16>
    %243 = vector.extract_strided_slice %68 {offsets = [112, 0], sizes = [16, 128], strides = [1, 1]} : vector<128x128xbf16> to vector<16x128xbf16>
    %cst_87 = arith.constant dense<0.000000e+00> : vector<8x128xf32>
    %244 = tpu.matmul %242, %243, %cst_87 {dimension_numbers = #tpu.dot_dimension_numbers<[1], [0], [0], [1], [0, 0, 1, 1], [], []>} : vector<8x16xbf16>, vector<16x128xbf16>, vector<8x128xf32> -> vector<8x128xf32>
    %245 = arith.addf %223, %244 : vector<8x128xf32>
    %c0_88 = arith.constant 0 : index
    %c0_89 = arith.constant 0 : index
    %246 = vector.load %arg14[%c0_88, %c0_89] : memref<1x128xf32, #tpu.memory_space<vmem>>, vector<1x128xf32>
    %247 = vector.broadcast %246 : vector<1x128xf32> to vector<8x128xf32>
    %248 = arith.addf %245, %247 : vector<8x128xf32>
    %c0_90 = arith.constant 0 : index
    %c0_91 = arith.constant 0 : index
    %c0_92 = arith.constant 0 : index
    %249 = vector.load %arg15[%c0_90, %c0_91, %c0_92] : memref<1x8x128xf32, #tpu.memory_space<vmem>>, vector<1x8x128xf32>
    %250 = vector.shape_cast %249 : vector<1x8x128xf32> to vector<8x128xf32>
    %251 = vector.shape_cast %248 : vector<8x128xf32> to vector<1x8x128xf32>
    tpu.vector_store %arg15[%c0_90, %c0_91, %c0_92], %251 {strides = array<i32>} : memref<1x8x128xf32, #tpu.memory_space<vmem>>, vector<1x8x128xf32>,
    return
  }
  func.func @transform_0(%arg0: i32) -> (i32, i32, i32) {
    %c0_i32 = arith.constant 0 : i32
    %c0_i32_0 = arith.constant 0 : i32
    %c0_i32_1 = arith.constant 0 : i32
    return %arg0, %c0_i32, %c0_i32_0 : i32, i32, i32
  }
  func.func @transform_1(%arg0: i32) -> (i32, i32, i32) {
    %c0_i32 = arith.constant 0 : i32
    %c0_i32_0 = arith.constant 0 : i32
    %c0_i32_1 = arith.constant 0 : i32
    return %arg0, %c0_i32, %c0_i32_0 : i32, i32, i32
  }
  func.func @transform_2(%arg0: i32) -> (i32, i32) {
    %c0_i32 = arith.constant 0 : i32
    %c0_i32_0 = arith.constant 0 : i32
    %c0_i32_1 = arith.constant 0 : i32
    return %c0_i32, %c0_i32_0 : i32, i32
  }
  func.func @transform_3(%arg0: i32) -> (i32, i32) {
    %c0_i32 = arith.constant 0 : i32
    %c0_i32_0 = arith.constant 0 : i32
    %c0_i32_1 = arith.constant 0 : i32
    return %c0_i32, %c0_i32_0 : i32, i32
  }
  func.func @transform_4(%arg0: i32) -> (i32, i32) {
    %c0_i32 = arith.constant 0 : i32
    %c0_i32_0 = arith.constant 0 : i32
    %c0_i32_1 = arith.constant 0 : i32
    return %c0_i32, %c0_i32_0 : i32, i32
  }
  func.func @transform_5(%arg0: i32) -> (i32, i32) {
    %c0_i32 = arith.constant 0 : i32
    %c0_i32_0 = arith.constant 0 : i32
    %c0_i32_1 = arith.constant 0 : i32
    return %c0_i32, %c0_i32_0 : i32, i32
  }
  func.func @transform_6(%arg0: i32) -> (i32, i32) {
    %c0_i32 = arith.constant 0 : i32
    %c0_i32_0 = arith.constant 0 : i32
    %c0_i32_1 = arith.constant 0 : i32
    return %c0_i32, %c0_i32_0 : i32, i32
  }
  func.func @transform_7(%arg0: i32) -> (i32, i32) {
    %c0_i32 = arith.constant 0 : i32
    %c0_i32_0 = arith.constant 0 : i32
    %c0_i32_1 = arith.constant 0 : i32
    return %c0_i32, %c0_i32_0 : i32, i32
  }
  func.func @transform_8(%arg0: i32) -> (i32, i32) {
    %c0_i32 = arith.constant 0 : i32
    %c0_i32_0 = arith.constant 0 : i32
    %c0_i32_1 = arith.constant 0 : i32
    return %c0_i32, %c0_i32_0 : i32, i32
  }
  func.func @transform_9(%arg0: i32) -> (i32, i32) {
    %c0_i32 = arith.constant 0 : i32
    %c0_i32_0 = arith.constant 0 : i32
    %c0_i32_1 = arith.constant 0 : i32
    return %c0_i32, %c0_i32_0 : i32, i32
  }
  func.func @transform_10(%arg0: i32) -> (i32, i32) {
    %c0_i32 = arith.constant 0 : i32
    %c0_i32_0 = arith.constant 0 : i32
    %c0_i32_1 = arith.constant 0 : i32
    return %c0_i32, %c0_i32_0 : i32, i32
  }
  func.func @transform_11(%arg0: i32) -> (i32, i32) {
    %c0_i32 = arith.constant 0 : i32
    %c0_i32_0 = arith.constant 0 : i32
    %c0_i32_1 = arith.constant 0 : i32
    return %c0_i32, %c0_i32_0 : i32, i32
  }
  func.func @transform_12(%arg0: i32) -> (i32, i32) {
    %c0_i32 = arith.constant 0 : i32
    %c0_i32_0 = arith.constant 0 : i32
    %c0_i32_1 = arith.constant 0 : i32
    return %c0_i32, %c0_i32_0 : i32, i32
  }
  func.func @transform_13(%arg0: i32) -> (i32, i32) {
    %c0_i32 = arith.constant 0 : i32
    %c0_i32_0 = arith.constant 0 : i32
    %c0_i32_1 = arith.constant 0 : i32
    return %c0_i32, %c0_i32_0 : i32, i32
  }
  func.func @transform_14(%arg0: i32) -> (i32, i32, i32) {
    %c0_i32 = arith.constant 0 : i32
    %c0_i32_0 = arith.constant 0 : i32
    %c0_i32_1 = arith.constant 0 : i32
    return %arg0, %c0_i32, %c0_i32_0 : i32, i32, i32
  }
}

</mosaic_0001>

<bundles_post_ra>
// kernel: tpu_custom_call.1
= control target key start
LH: loop header
LB: loop body
LE: loop exit
PB: predicated region body
PF: predicated region fallthrough
CT: control target
= control target key end

     0   :  { %s3919_s0 = inlined_call_operand.hbm [shape: f32[2,8,128], index: 0, kind: input, shape index: {}]   ;;  %s3920_s1 = inlined_call_operand.hbm [shape: f32[2,16,128], index: 1, kind: input, shape index: {}]   ;;  %s3921_s2 = inlined_call_operand.vmem [shape: f32[1,128], index: 2, kind: input, shape index: {}]   ;;  %s3922_s3 = inlined_call_operand.vmem [shape: f32[1,128], index: 3, kind: input, shape index: {}]   ;;  %s3923_s4 = inlined_call_operand.vmem [shape: f32[1,128], index: 4, kind: input, shape index: {}]   ;;  %s3924_s5 = inlined_call_operand.vmem [shape: f32[1,128], index: 5, kind: input, shape index: {}]   ;;  %s3925_s6 = inlined_call_operand.hbm [shape: bf16[128,128], index: 6, kind: input, shape index: {}]   ;;  %s3926_s7 = inlined_call_operand.vmem [shape: f32[1,128], index: 7, kind: input, shape index: {}]   ;;  %s3927_s8 = inlined_call_operand.hbm [shape: bf16[128,128], index: 8, kind: input, shape index: {}]   ;;  %s3928_s9 = inlined_call_operand.vmem [shape: f32[1,128], index: 9, kind: input, shape index: {}]   ;;  %s3929_s10 = inlined_call_operand.hbm [shape: bf16[128,128], index: 10, kind: input, shape index: {}]   ;;  %s3930_s11 = inlined_call_operand.vmem [shape: f32[1,128], index: 11, kind: input, shape index: {}]   ;;  %s3931_s12 = inlined_call_operand.hbm [shape: bf16[128,128], index: 12, kind: input, shape index: {}]   ;;  %s3932_s13 = inlined_call_operand.vmem [shape: f32[1,128], index: 13, kind: input, shape index: {}]   ;;  %s3933_s14 = inlined_call_operand.hbm [shape: f32[2,8,128], index: 14, kind: output, shape index: {}]  }
   0x1   :  { %3938 = sst [smem:[#allocation20_spill]] %s3919_s0 }
   0x2   :  { %3939 = sst [smem:[#allocation21_spill]] %s3922_s3 }
   0x3   :  { %3940 = sst [smem:[#allocation22_spill]] %s3925_s6 }
   0x4   :  { %3941 = sst [smem:[#allocation23_spill]] %s3926_s7 }
   0x5   :  { %3942 = sst [smem:[#allocation24_spill]] %s3927_s8 }
   0x6   :  { %3943 = sst [smem:[#allocation25_spill]] %s3928_s9 }
   0x7   :  { %3944 = sst [smem:[#allocation26_spill]] %s3929_s10 }
   0x8   :  { %3945 = sst [smem:[#allocation27_spill]] %s3930_s11 }
   0x9   :  { %3946 = sst [smem:[#allocation28_spill]] %s3932_s13 }
   0xa   :  { %3947 = sst [smem:[#allocation29_spill]] %s3933_s14 }
   0xb   :  { %19 = vsyncpa [#allocation3], 0 }
   0xc   :  { %21 = vsyncpa [#allocation3 + $0x1], 0 }
   0xd   :  { %22 = vsyncpa [#allocation6], 0 }
   0xe   :  { %24 = vsyncpa [#allocation6 + $0x1], 0 }
   0xf   :  { %25 = vsyncpa [#allocation9], 0 }
  0x10   :  { %26 = vsyncpa [#allocation12], 0 }
  0x11   :  { %27 = vsyncpa [#allocation4], 0 }
  0x12   :  { %29 = vsyncpa [#allocation4 + $0x1], 0  ;;  %s3332_s29 = smov 0   ;;  %s3334_s30 = smov 0  }
  0x13   :  { %s3336_s15 = smov 0   ;;  %s3338_s16 = smov 0  }
  0x14 LB: > { %s3237_s17 = smov [#allocation7]   ;;  %s3353_s19 = sadd.s32 4294967295, %s3235_s16   ;;  %s3235_s16 = sphi %s3338_s16, %s3981_s16   ;;  %s3231_s15 = sphi %s3336_s15, %s3980_s15   ;;  %s3227_s30 = sphi %s3334_s30, %s3979_s30   ;;  %s3223_s29 = sphi %s3332_s29, %s3978_s29  }
  0x15   : > { %s394_s18 = sshll.u32 %s3237_s17, 4  ;;  %p2439_p0 = scmp.ge.s32.totalorder %s3235_s16, 1  ;;  %s3358_s18 = int_to_ptr.vmem [resolvable:$true] %s394_s18 }
  0x16   : > { %p3935_p1 = scmp.eq.s32.totalorder %s3353_s19, 0  ;;  %p370_p2 = scmp.lt.s32.totalorder %s3235_s16, 3 }
  0x17   : > { %s3238_s21 = smov [#allocation8]   ;;  %s3239_s24 = smov [#allocation10]  }
  0x18   : > { %p3360_p3 = pnand %p2439_p0, %p370_p2  ;;  %s410_s22 = sshll.u32 %s3238_s21, 4  ;;  %s3373_s22 = int_to_ptr.vmem [resolvable:$true] %s410_s22 }
  0x19   : > { %s426_s25 = sshll.u32 %s3239_s24, 4  ;;  %s3950_s6 = sld [smem:[#allocation22_spill]]  ;;  %s3375_s25 = int_to_ptr.vmem [resolvable:$true] %s426_s25 }
  0x1a   : > { %s3948_s20 = scalar_select %p3360_p3, 1, 0 }
  0x1b   : > { %p2828_p5 = pneg %p3360_p3 }
  0x1d   : > { %p3369_p6 = pnand %p2828_p5, %p3935_p1 }
  0x1f   : > { %s2981_s28 = scalar_lea.hbm %s3950_s6, 1024  ;;  %p3385_p8 = pneg %p3369_p6 }
  0x20   : > { %p2982_p7 = scmp.ne.s32.totalorder %s3950_s6, %s2981_s28  ;;  %p2988_p11 = scmp.lt.u32.totalorder %s2981_s28, %s3950_s6 }
  0x22   : > { %p2984_p9 = pnand %p3385_p8, %p2982_p7 }
  0x24   : > { %p2985_p10 = pneg %p2984_p9 }
  0x26   : > { %p2990_p12 = pnand %p2988_p11, %p2985_p10 }
  0x28   : > { %2993 = shalt.err (!%p2990_p12)
}
  0x29   : > { %s2994_s14 = scalar_lea.vmem %s3358_s18, 1024  ;;  %p3002_p5 = scmp.lt.s32.totalorder %s3358_s18, %s3358_s18 }
  0x2a   : > { %p2995_p13 = scmp.ne.s32.totalorder %s3358_s18, %s2994_s14  ;;  %p3003_p4 = scmp.lt.s32.totalorder %s2994_s14, %s2994_s14 }
  0x2c   : > { %p2997_p0 = pnand %p2995_p13, %p3385_p8  ;;  %p3004_p7 = por %p3003_p4, %p3002_p5 }
  0x2e   : > { %p2998_p2 = pneg %p2997_p0 }
  0x30   : > { %p3005_p9 = pnand %p3004_p7, %p2998_p2 }
  0x32   : > { %3008 = shalt.err (!%p3005_p9)
}
  0x33   : > { %s3240_s26 = smov 64   ;;  %s3241_s13 = smov 4  }
  0x34   : > { %2831 = dma.hbm_to_vmem [thread:$0]  (!%p3369_p6), %s3950_s6, 1024, %s3358_s18, [#allocation6], %s3240_s26, %s3240_s26, %s3241_s13  }
  0x35   : > { %s3952_s8 = sld [smem:[#allocation24_spill]] }
  0x3b   : > { %s3009_s14 = scalar_lea.hbm %s3952_s8, 1024 }
  0x3c   : > { %p3010_p4 = scmp.ne.s32.totalorder %s3952_s8, %s3009_s14  ;;  %p3016_p12 = scmp.lt.u32.totalorder %s3009_s14, %s3952_s8 }
  0x3e   : > { %p3012_p10 = pnand %p3010_p4, %p3385_p8 }
  0x40   : > { %p3013_p11 = pneg %p3012_p10 }
  0x42   : > { %p3018_p13 = pnand %p3016_p12, %p3013_p11 }
  0x44   : > { %3021 = shalt.err (!%p3018_p13)
}
  0x45   : > { %s3022_s18 = scalar_lea.vmem %s3373_s22, 1024  ;;  %p3030_p7 = scmp.lt.s32.totalorder %s3373_s22, %s3373_s22 }
  0x46   : > { %p3023_p0 = scmp.ne.s32.totalorder %s3373_s22, %s3022_s18  ;;  %p3031_p9 = scmp.lt.s32.totalorder %s3022_s18, %s3022_s18 }
  0x48   : > { %p3025_p2 = pnand %p3023_p0, %p3385_p8  ;;  %p3032_p4 = por %p3031_p9, %p3030_p7 }
  0x4a   : > { %p3026_p5 = pneg %p3025_p2 }
  0x4c   : > { %p3033_p10 = pnand %p3032_p4, %p3026_p5 }
  0x4e   : > { %3036 = shalt.err (!%p3033_p10)
}
  0x4f   : > { %2834 = dma.hbm_to_vmem [thread:$0]  (!%p3369_p6), %s3952_s8, 1024, %s3373_s22, [#allocation9], %s3240_s26, %s3240_s26, %s3241_s13  }
  0x50   : > { %s3953_s10 = sld [smem:[#allocation26_spill]] }
  0x56   : > { %s3037_s27 = scalar_lea.hbm %s3953_s10, 1024 }
  0x57   : > { %p3038_p11 = scmp.ne.s32.totalorder %s3953_s10, %s3037_s27  ;;  %p3044_p0 = scmp.lt.u32.totalorder %s3037_s27, %s3953_s10 }
  0x59   : > { %p3040_p12 = pnand %p3038_p11, %p3385_p8 }
  0x5b   : > { %p3041_p13 = pneg %p3040_p12 }
  0x5d   : > { %p3046_p2 = pnand %p3044_p0, %p3041_p13 }
  0x5f   : > { %3049 = shalt.err (!%p3046_p2)
}
  0x60   : > { %s3050_s22 = scalar_lea.vmem %s3375_s25, 1024  ;;  %p3058_p4 = scmp.lt.s32.totalorder %s3375_s25, %s3375_s25 }
  0x61   : > { %p3051_p5 = scmp.ne.s32.totalorder %s3375_s25, %s3050_s22  ;;  %p3059_p10 = scmp.lt.s32.totalorder %s3050_s22, %s3050_s22 }
  0x63   : > { %p3053_p7 = pnand %p3051_p5, %p3385_p8  ;;  %p3060_p11 = por %p3059_p10, %p3058_p4 }
  0x65   : > { %p3054_p9 = pneg %p3053_p7 }
  0x67   : > { %p3061_p12 = pnand %p3060_p11, %p3054_p9 }
  0x69   : > { %3064 = shalt.err (!%p3061_p12)
}
  0x6a   : > { %2837 = dma.hbm_to_vmem [thread:$0]  (!%p3369_p6), %s3953_s10, 1024, %s3375_s25, [#allocation9], %s3240_s26, %s3240_s26, %s3241_s13  }
  0x6b   : > { %s3242_s7 = smov [#allocation11]   ;;  %s3065_s28 = scalar_lea.hbm %s3931_s12, 1024 }
  0x6c   : > { %s442_s9 = sshll.u32 %s3242_s7, 4  ;;  %p3066_p13 = scmp.ne.s32.totalorder %s3931_s12, %s3065_s28  ;;  %s443_s9 = int_to_ptr.vmem [resolvable:$true] %s442_s9 }
  0x6d   : > { %p3072_p5 = scmp.lt.u32.totalorder %s3065_s28, %s3931_s12 }
  0x6e   : > { %p3068_p0 = pnand %p3066_p13, %p3385_p8 }
  0x70   : > { %p3069_p2 = pneg %p3068_p0 }
  0x72   : > { %p3074_p7 = pnand %p3072_p5, %p3069_p2 }
  0x74   : > { %3077 = shalt.err (!%p3074_p7)
}
  0x75   : > { %s3078_s25 = scalar_lea.vmem %s443_s9, 1024  ;;  %p3086_p11 = scmp.lt.s32.totalorder %s443_s9, %s443_s9 }
  0x76   : > { %p3079_p9 = scmp.ne.s32.totalorder %s443_s9, %s3078_s25  ;;  %p3087_p12 = scmp.lt.s32.totalorder %s3078_s25, %s3078_s25 }
  0x78   : > { %p3081_p4 = pnand %p3079_p9, %p3385_p8  ;;  %p3088_p1 = por %p3087_p12, %p3086_p11 }
  0x7a   : > { %p3082_p10 = pneg %p3081_p4 }
  0x7c   : > { %p3089_p3 = pnand %p3088_p1, %p3082_p10 }
  0x7e   : > { %3092 = shalt.err (!%p3089_p3)
}
  0x7f   : > { %2840 = dma.hbm_to_vmem [thread:$0]  (!%p3369_p6), %s3931_s12, 1024, %s443_s9, [#allocation12], %s3240_s26, %s3240_s26, %s3241_s13  }
  0x80   : > { %s2438_s23 = sadd.s32 4294967294, %s3235_s16   ;;  %s3484_s21 = sadd.s32 1, %s3235_s16  }
  0x81   : > { %s39_s7 = ssub.s32 %s3235_s16, %s3484_s21  ;;  %s42_s11 = sadd.s32 1, %s3231_s15 }
  0x82   : > { %p40_p1 = scmp.eq.s32.totalorder %s39_s7, 0  ;;  %p49_p3 = scmp.ne.s32.totalorder %s3231_s15, %s3227_s30 }
  0x83   : > { %p50_p8 = scmp.eq.s32.totalorder %s3235_s16, 0  ;;  %p55_p13 = scmp.ne.s32.totalorder %s3227_s30, %s3223_s29 }
  0x84   : > { %s3495_s27 = scalar_select %p40_p1, %s3231_s15, %s42_s11  }
  0x85   : > { %p3497_p0 = por %p50_p8, %p49_p3  ;;  %p3955_p2 = scmp.eq.s32.totalorder %s3353_s19, 0 }
  0x86   : > { %p357_p5 = scmp.eq.s32.totalorder %s3353_s19, 1  ;;  %p363_p7 = scmp.eq.s32.totalorder %s2438_s23, 1 }
  0x87   : > { %p3503_p6 = por %p3955_p2, %p55_p13  ;;  %p2856_p9 = scmp.lt.s32.totalorder %s3235_s16, 2 }
  0x88   : > { %s3510_s13 = sand.u32 1, %s3231_s15   ;;  %p3512_p4 = por %p357_p5, %p49_p3 }
  0x89   : > { %p3516_p10 = por %p363_p7, %p55_p13  ;;  %s2445_s24 = sshll.u32 %s3510_s13, 3 }
  0x8a   : > { %s3957_s9 = scalar_select %p3512_p4, 1, 0 }
  0x8b   : > { %s3958_s17 = scalar_select %p3516_p10, 1, 0 }
  0x8c   : > { %s2446_s14 = sshll.u32 %s3235_s16, 7  ;;  %s3959_s0 = sld [smem:[#allocation20_spill]] }
  0x8d   : > { %s463_s3 = scalar_lea.vmem [#allocation2], %s2445_s24  ;;  %p3531_p11 = pnand %p2856_p9, %p3497_p0 }
  0x8e   : > { %s470_s23 = sshll.u32 %s463_s3, 4  ;;  %s2447_s11 = sshll.u32 %s3510_s13, 4  ;;  %s3527_s23 = int_to_ptr.vmem [resolvable:$true] %s470_s23 }
  0x8f   : > { %s460_s22 = scalar_lea.sflag [#allocation3], %s3510_s13  ;;  %p3095_p1 = pneg %p3531_p11 }
  0x92   : > { %s3525_s18 = scalar_lea.hbm %s3959_s0, %s2446_s14  ;;  %s3098_s28 = scalar_lea.hbm %s3959_s0, 256 }
  0x93   : > { %s3093_s14 = scalar_lea.hbm %s3525_s18, 128  ;;  %p3099_p13 = scmp.lt.u32.totalorder %s3525_s18, %s3959_s0 }
  0x94   : > { %p3094_p12 = scmp.ne.s32.totalorder %s3525_s18, %s3093_s14  ;;  %p3100_p0 = scmp.lt.u32.totalorder %s3098_s28, %s3093_s14 }
  0x95   : > { %p3102_p5 = scmp.lt.u32.totalorder %s3093_s14, %s3525_s18 }
  0x96   : > { %p3096_p3 = pnand %p3095_p1, %p3094_p12  ;;  %p3101_p2 = por %p3100_p0, %p3099_p13 }
  0x98   : > { %p3097_p8 = pneg %p3096_p3  ;;  %p3103_p7 = por %p3102_p5, %p3101_p2 }
  0x9a   : > { %p3104_p9 = pnand %p3103_p7, %p3097_p8 }
  0x9c   : > { %3107 = shalt.err (!%p3104_p9)
}
  0x9d   : > { %s3108_s6 = scalar_lea.vmem %s3527_s23, 128  ;;  %s3243_s24 = smov [#allocation2]  }
  0x9e   : > { %p3109_p12 = scmp.ne.s32.totalorder %s3527_s23, %s3108_s6  ;;  %s3113_s25 = sshll.u32 %s3243_s24, 4  ;;  %s3114_s25 = int_to_ptr.vmem [resolvable:$false] %s3113_s25 }
  0x9f   : > { %s3115_s8 = scalar_lea.vmem %s3114_s25, 256  ;;  %p3116_p4 = scmp.lt.s32.totalorder %s3527_s23, %s3114_s25 }
  0xa0   : > { %p3111_p3 = pnand %p3109_p12, %p3095_p1  ;;  %p3117_p13 = scmp.lt.s32.totalorder %s3115_s8, %s3108_s6 }
  0xa2   : > { %p3112_p10 = pneg %p3111_p3  ;;  %p3118_p0 = por %p3117_p13, %p3116_p4 }
  0xa4   : > { %p3119_p2 = pnand %p3118_p0, %p3112_p10 }
  0xa6   : > { %3122 = shalt.err (!%p3119_p2)
}
  0xa7   : > { %2844 = dma.hbm_to_vmem [thread:$0]  (!%p3531_p11), %s3525_s18, 128, %s3527_s23, %s460_s22  }
  0xa8   : > { %s481_s14 = scalar_lea.vmem [#allocation5], %s2447_s11  ;;  %s2526_s3 = sshll.u32 %s3235_s16, 8 }
  0xa9   : > { %s488_s28 = sshll.u32 %s481_s14, 4  ;;  %s3571_s25 = scalar_lea.hbm %s3920_s1, %s2526_s3  ;;  %s3565_s28 = int_to_ptr.vmem [resolvable:$true] %s488_s28 }
  0xaa   : > { %s3961_s8 = sand.u32 1, %s3235_s16   ;;  %s3123_s10 = scalar_lea.hbm %s3571_s25, 256 }
  0xab   : > { %s3575_s0 = scalar_lea.sflag [#allocation6], %s3961_s8  ;;  %p3124_p4 = scmp.ne.s32.totalorder %s3571_s25, %s3123_s10 }
  0xac   : > { %s3128_s23 = scalar_lea.hbm %s3920_s1, 512  ;;  %p3129_p5 = scmp.lt.u32.totalorder %s3571_s25, %s3920_s1 }
  0xad   : > { %p3126_p10 = pnand %p3124_p4, %p3095_p1  ;;  %p3130_p7 = scmp.lt.u32.totalorder %s3128_s23, %s3123_s10 }
  0xae   : > { %p3132_p12 = scmp.lt.u32.totalorder %s3123_s10, %s3571_s25 }
  0xaf   : > { %p3127_p8 = pneg %p3126_p10  ;;  %p3131_p9 = por %p3130_p7, %p3129_p5 }
  0xb1   : > { %p3133_p3 = por %p3132_p12, %p3131_p9 }
  0xb3   : > { %p3134_p13 = pnand %p3133_p3, %p3127_p8 }
  0xb5   : > { %3137 = shalt.err (!%p3134_p13)
}
  0xb6   : > { %s3138_s14 = scalar_lea.vmem %s3565_s28, 256  ;;  %s3244_s3 = smov [#allocation5]  }
  0xb7   : > { %p3139_p0 = scmp.ne.s32.totalorder %s3565_s28, %s3138_s14  ;;  %s3143_s24 = sshll.u32 %s3244_s3, 4  ;;  %s3144_s24 = int_to_ptr.vmem [resolvable:$false] %s3143_s24 }
  0xb8   : > { %s3145_s6 = scalar_lea.vmem %s3144_s24, 512  ;;  %p3146_p10 = scmp.lt.s32.totalorder %s3565_s28, %s3144_s24 }
  0xb9   : > { %p3141_p2 = pnand %p3139_p0, %p3095_p1  ;;  %p3147_p5 = scmp.lt.s32.totalorder %s3145_s6, %s3138_s14 }
  0xbb   : > { %p3142_p4 = pneg %p3141_p2  ;;  %p3148_p7 = por %p3147_p5, %p3146_p10 }
  0xbd   : > { %p3149_p9 = pnand %p3148_p7, %p3142_p4 }
  0xbf   : > { %3152 = shalt.err (!%p3149_p9)
}
  0xc0   : > { %s3245_s10 = smov 128   ;;  %s3246_s8 = smov 8  }
  0xc1   : > { %2847 = dma.hbm_to_vmem [thread:$0]  (!%p3531_p11), %s3571_s25, 256, %s3565_s28, %s3575_s0, %s3245_s10, %s3245_s10, %s3246_s8  }
  0xc2   : > { %p3962_p1 = scmp.ne.s32.totalorder %s3948_s20, 0 }
  0xc3   : > { %s3604_s13 = sand.u32 (!%p3962_p1), 1, %s3227_s30  }
  0xc4   : > { %500 = sbr.rel (%p3962_p1) target bundleno = 4471 (0x1177), region = 76  ;;  %s2451_s18 = sshll.u32 (!%p3962_p1), %s3604_s13, 3 }
  0xc5   : > { %s503_s23 = scalar_lea.sflag (!%p3962_p1), [#allocation3], %s3604_s13  ;;  %s506_s11 = scalar_lea.vmem (!%p3962_p1), [#allocation2], %s2451_s18 }
  0xcb   : > { %3198 = dma.done.wait (%p3503_p6), %s503_s23, 128  }
  0xcc   : > { %3200 = vsyncadd (%p3503_p6), %s503_s23, 4294967168  ;;  %s511_s0 = sand.u32 1, %s3353_s19   ;;  %s2452_s20 = sshll.u32 %s3604_s13, 4 }
  0xcd   : > { %s512_s7 = scalar_lea.sflag [#allocation6], %s511_s0  ;;  %s515_s28 = scalar_lea.vmem [#allocation5], %s2452_s20 }
  0xce   : > { %3202 = dma.done.wait (%p3503_p6), %s512_s7, 256  }
  0xcf   : > { %3204 = vsyncadd (%p3503_p6), %s512_s7, 4294967040  ;;  %p3963_p11 = scmp.eq.s32.totalorder %s3353_s19, 0 }
  0xd1   : > { %3206 = dma.done.wait (%p3963_p11), [#allocation6], 1024   ;;  %p3964_p8 = pmov %p3963_p11 }
  0xd3   : > { %3208 = vsyncadd (%p3964_p8), [#allocation6], 4294966272  ;;  %p3965_p12 = pmov %p3964_p8 }
  0xd4   : > { %p3966_p3 = pmov %p3964_p8 }
  0xd5   : > { %3210 = dma.done.wait (%p3965_p12), [#allocation9], 2048  }
  0xd6   : > { %3212 = vsyncadd (%p3966_p3), [#allocation9], 4294965248  ;;  %p3967_p13 = pmov %p3966_p3 }
  0xd7   : > { %p3968_p0 = pmov %p3966_p3 }
  0xd8   : > { %3214 = dma.done.wait (%p3967_p13), [#allocation12], 1024  }
  0xd9   : > { %3216 = vsyncadd (%p3968_p0), [#allocation12], 4294966272  ;;  %v611_v0 = vld [vmem:[%s515_s28] sm:$0xff]  ;;  %v612_v1 = vld [vmem:[%s515_s28 + $0x8] sm:$0xff]  ;;  %v3247_v5 = vmov 0.0   ;;  %vm3248_vm0 = vmmov 0  }
  0xda   : > { %v582_v2 = vld [vmem:[%s506_s11] sm:$0xff]  ;;  %615 = vadd.xlane.f32.xlu0 %v611_v0  ;;  %v2911_v3 = vld [vmem:[#allocation7] sm:$0xff]   ;;  %2602 = vmatprep.subr.bf16.mxu0 %v3247_v5  ;;  %v2913_v6 = vld [vmem:[#allocation7 + $0x8] sm:$0xff]   ;;  %s3969_s8 = sld [smem:[#allocation21_spill]]  ;;  %s3970_s0 = sld [smem:[#allocation25_spill]]  ;;  %vm1009_vm1 = vcmask 130048  }
  0xdb   : > { %585 = vadd.xlane.f32.xlu1 %v582_v2  ;;  %v2912_v4 = vld [vmem:[#allocation8] sm:$0xff]   ;;  %2622 = vmatprep.subr.bf16.mxu1 %v3247_v5  ;;  %v2914_v19 = vld [vmem:[#allocation8 + $0x8] sm:$0xff]   ;;  %v2915_v20 = vld [vmem:[#allocation7 + $0x10] sm:$0xff]   ;;  %s3971_s28 = sld [smem:[#allocation23_spill]]  ;;  %s3249_s26 = smov 112  }
  0xdc   : > { %2603 = vmatpush3.bf16.msra.mxu0 %v2911_v3  ;;  %2623 = vmatpush3.bf16.msra.mxu1 %v2912_v4  ;;  %v2916_v21 = vld [vmem:[#allocation8 + $0x10] sm:$0xff]   ;;  %v2917_v22 = vld [vmem:[#allocation7 + $0x18] sm:$0xff]   ;;  %v2919_v24 = vld [vmem:[#allocation7 + $0x20] sm:$0xff]   ;;  %s3972_s14 = sld [smem:[#allocation27_spill]]  ;;  %s3250_s3 = smov 96  }
  0xdd   : > { %2604 = vmatprep.subr.bf16.mxu0 %v3247_v5  ;;  %2624 = vmatprep.subr.bf16.mxu1 %v3247_v5  ;;  %v2918_v23 = vld [vmem:[#allocation8 + $0x18] sm:$0xff]   ;;  %v2920_v25 = vld [vmem:[#allocation8 + $0x20] sm:$0xff]   ;;  %v2921_v26 = vld [vmem:[#allocation7 + $0x28] sm:$0xff]   ;;  %s3251_s24 = smov 80   ;;  %s3252_s6 = smov 64  }
  0xde   : > { %617 = vadd.xlane.f32.xlu0 %v612_v1  ;;  %2618 = vmatprep.mubr.msk.bf16.mxu0 %vm3248_vm0, %v3247_v5  ;;  %v2922_v27 = vld [vmem:[#allocation8 + $0x28] sm:$0xff]   ;;  %v2923_v28 = vld [vmem:[#allocation7 + $0x30] sm:$0xff]   ;;  %v2925_v30 = vld [vmem:[#allocation7 + $0x38] sm:$0xff]   ;;  %s3253_s10 = smov 48   ;;  %s3255_s23 = smov 16  }
  0xdf   : > { %2638 = vmatprep.mubr.msk.bf16.mxu1 %vm3248_vm0, %v3247_v5  ;;  %v2924_v29 = vld [vmem:[#allocation8 + $0x30] sm:$0xff]   ;;  %v2926_v31 = vld [vmem:[#allocation8 + $0x38] sm:$0xff]   ;;  %v2927_v58 = vld [vmem:[#allocation10] sm:$0xff]   ;;  %s3973_s20 = sld [smem:[#allocation28_spill]]  ;;  %s2523_s7 = sshll.u32 %s3353_s19, 7 }
  0xe0   : > { %2605 = vmatpush3.bf16.msra.mxu0 %v2913_v6  ;;  %2625 = vmatpush3.bf16.msra.mxu1 %v2914_v19  ;;  %v2460_v43 = vld [vmem:[%s3923_s4] ss:$0 sm:$0xff]  ;;  %v2928_v60 = vld [vmem:[#allocation10 + $0x8] sm:$0xff]   ;;  %v2930_v62 = vld [vmem:[#allocation10 + $0x18] sm:$0xff]   ;;  %s2294_s19 = scalar_lea.sflag [#allocation4], %s3604_s13  ;;  %p3975_p2 = scmp.ne.s32.totalorder %s3957_s9, 0 }
  0xe1   : > { %2606 = vmatprep.subr.bf16.mxu0 %v3247_v5  ;;  %2626 = vmatprep.subr.bf16.mxu1 %v3247_v5  ;;  %v2458_v46 = vld [vmem:[%s3921_s2] ss:$0 sm:$0xff]  ;;  %v2931_v63 = vld [vmem:[#allocation10 + $0x20] sm:$0xff]  }
  0xe2   : > { %v2461_v50 = vld [vmem:[%s3924_s5] ss:$0 sm:$0xff] }
  0xe3   : > { %v2459_v51 = vld [vmem:[%s3969_s8] ss:$0 sm:$0xff]  ;;  %s3254_s8 = smov 32  }
  0xe4   : > { %2607 = vmatpush3.bf16.msra.mxu0 %v2915_v20  ;;  %2627 = vmatpush3.bf16.msra.mxu1 %v2916_v21  ;;  %v2929_v61 = vld [vmem:[#allocation10 + $0x10] sm:$0xff]  }
  0xe5   : > { %2608 = vmatprep.subr.bf16.mxu0 %v3247_v5  ;;  %2628 = vmatprep.subr.bf16.mxu1 %v3247_v5  ;;  %v2471_v3 = vld [vmem:[%s3970_s0] ss:$0 sm:$0xff] }
  0xe6   : > { %v2480_v20 = vld [vmem:[%s3972_s14] ss:$0 sm:$0xff]  ;;  %s3974_s14 = sld [smem:[#allocation29_spill]] }
  0xe8   : > { %2609 = vmatpush3.bf16.msra.mxu0 %v2917_v22  ;;  %2629 = vmatpush3.bf16.msra.mxu1 %v2918_v23 }
  0xe9   : > { %2610 = vmatprep.subr.bf16.mxu0 %v3247_v5  ;;  %2630 = vmatprep.subr.bf16.mxu1 %v3247_v5 }
  0xec   : > { %2611 = vmatpush3.bf16.msra.mxu0 %v2919_v24  ;;  %2631 = vmatpush3.bf16.msra.mxu1 %v2920_v25 }
  0xed   : > { %2612 = vmatprep.subr.bf16.mxu0 %v3247_v5  ;;  %2632 = vmatprep.subr.bf16.mxu1 %v3247_v5 }
  0xf0   : > { %2613 = vmatpush3.bf16.msra.mxu0 %v2921_v26  ;;  %2633 = vmatpush3.bf16.msra.mxu1 %v2922_v27 }
  0xf1   : > { %2614 = vmatprep.subr.bf16.mxu0 %v3247_v5  ;;  %2634 = vmatprep.subr.bf16.mxu1 %v3247_v5 }
  0xf4   : > { %2615 = vmatpush3.bf16.msra.mxu0 %v2923_v28  ;;  %2635 = vmatpush3.bf16.msra.mxu1 %v2924_v29 }
  0xf5   : > { %2616 = vmatprep.subr.bf16.mxu0 %v3247_v5  ;;  %2636 = vmatprep.subr.bf16.mxu1 %v3247_v5 }
  0xf8   : > { %2617 = vmatpush3.bf16.msra.mxu0 %v2925_v30  ;;  %2637 = vmatpush3.bf16.msra.mxu1 %v2926_v31 }
  0xf9   : > { %2642 = vmatprep.subr.bf16.mxu0 %v3247_v5  ;;  %2662 = vmatprep.subr.bf16.mxu1 %v3247_v5 }
 0x167   : > { %v616_v7 = vpop.xlane.xlu0 %615 }
 0x168   : > { %v586_v8 = vpop.xlane.xlu1 %585  ;;  %v619_v9 = vmul.f32 0.0078125, %v616_v7 }
 0x169   : > { %v588_v10 = vmul.f32 0.0078125, %v586_v8 }
 0x16a   : > { %v3637_v11 = vsub.f32 %v611_v0, %v619_v9  ;;  %v2932_v0 = vld [vmem:[#allocation10 + $0x28] sm:$0xff]  }
 0x16b   : > { %v3639_v12 = vsub.f32 %v582_v2, %v588_v10  ;;  %v618_v13 = vpop.xlane.xlu0 %617  ;;  %v2934_v2 = vld [vmem:[#allocation10 + $0x38] sm:$0xff]  }
 0x16c   : > { %v620_v14 = vmul.f32 0.0078125, %v618_v13  ;;  %v623_v15 = vmul.f32 %v3637_v11, %v3637_v11 }
 0x16d   : > { %v590_v17 = vmul.f32 %v3639_v12, %v3639_v12 }
 0x16e   : > { %v3643_v16 = vsub.f32 %v612_v1, %v620_v14  ;;  %625 = vadd.xlane.f32.xlu1 %v623_v15  ;;  %v2933_v1 = vld [vmem:[#allocation10 + $0x30] sm:$0xff]  }
 0x170   : > { %v624_v18 = vmul.f32 %v3643_v16, %v3643_v16 }
 0x172   : > { %627 = vadd.xlane.f32.xlu0 %v624_v18  ;;  %591 = vadd.xlane.f32.xlu1 %v590_v17 }
 0x1fb   : > { %v626_v32 = vpop.xlane.xlu1 %625 }
 0x1fc   : > { %v629_v33 = vmul.f32 0.0078125, %v626_v32 }
 0x1fe   : > { %v631_v34 = vadd.f32 1e-06, %v629_v33 }
 0x1ff   : > { %v628_v35 = vpop.xlane.xlu0 %627  ;;  %v592_v36 = vpop.xlane.xlu1 %591 }
 0x200   : > { %2943 = vrsqrt.f32 %v631_v34  ;;  %v630_v37 = vmul.f32 0.0078125, %v628_v35  ;;  %v593_v38 = vmul.f32 0.0078125, %v592_v36 }
 0x202   : > { %v632_v39 = vadd.f32 1e-06, %v630_v37  ;;  %v594_v40 = vadd.f32 1e-06, %v593_v38 }
 0x204   : > { %2945 = vrsqrt.f32 %v632_v39 }
 0x205   : > { %2947 = vrsqrt.f32 %v594_v40 }
 0x20a   : > { %v2944_v41 = vpop.eup %2943 }
 0x20b   : > { %v635_v42 = vmul.f32 %v2944_v41, %v3637_v11 }
 0x20d   : > { %v643_v48 = vmul.f32 %v2460_v43, %v635_v42 }
 0x20e   : > { %v2946_v44 = vpop.eup %2945 }
 0x20f   : > { %v2948_v45 = vpop.eup %2947  ;;  %v636_v47 = vmul.f32 %v2946_v44, %v3643_v16  ;;  %v651_v54 = vadd.f32 %v2461_v50, %v643_v48  ;;  %v2462_v16 = vld [vmem:[%s3971_s28] ss:$0 sm:$0xff]  ;;  %s580_s28 = scalar_lea.vmem [#allocation13], %s2451_s18  ;;  %s3256_s18 = smov [#allocation13]  }
 0x210   : > { %v596_v49 = vmul.f32 %v2948_v45, %v3639_v12 }
 0x211   : > { %v644_v52 = vmul.f32 %v2460_v43, %v636_v47 }
 0x212   : > { %v603_v53 = vmul.f32 %v2458_v46, %v596_v49 }
 0x213   : > { %v652_v55 = vadd.f32 %v2461_v50, %v644_v52 }
 0x214   : > { %v610_v56 = vadd.f32 %v2459_v51, %v603_v53 }
 0x215   : > { %v654_v57 = vpack.c.bf16 %v652_v55, %v651_v54 }
 0x216   : > { %v653_v59 = vpack.c.bf16 %v610_v56, %v610_v56 }
 0x217   : > { %2639 = vmatmul.mubr.bf16.vlgmr.msra.gmra.mrb[0].mxu1 %v654_v57 }
 0x218   : > { %2619 = vmatmul.mubr.bf16.vlgmr.msra.gmra.mrb[0].mxu0 %v653_v59  ;;  %2664 = vmatprep.mubr.msk.bf16.mxu1 %vm3248_vm0, %v3247_v5 }
 0x219   : > { %2643 = vmatpush3.bf16.msra.mxu0 %v2927_v58  ;;  %2658 = vmatprep.mubr.msk.bf16.mxu0 %vm3248_vm0, %v3247_v5  ;;  %v2935_v58 = vld [vmem:[#allocation11] sm:$0xff]  }
 0x21a   : > { %2644 = vmatprep.subr.bf16.mxu0 %v3247_v5 }
 0x21d   : > { %2645 = vmatpush3.bf16.msra.mxu0 %v2928_v60 }
 0x21e   : > { %2646 = vmatprep.subr.bf16.mxu0 %v3247_v5 }
 0x221   : > { %2647 = vmatpush3.bf16.msra.mxu0 %v2929_v61  ;;  %v2936_v61 = vld [vmem:[#allocation11 + $0x8] sm:$0xff]  }
 0x222   : > { %2648 = vmatprep.subr.bf16.mxu0 %v3247_v5 }
 0x225   : > { %2649 = vmatpush3.bf16.msra.mxu0 %v2930_v62 }
 0x226   : > { %2650 = vmatprep.subr.bf16.mxu0 %v3247_v5 }
 0x229   : > { %2651 = vmatpush3.bf16.msra.mxu0 %v2931_v63 }
 0x22a   : > { %2652 = vmatprep.subr.bf16.mxu0 %v3247_v5 }
 0x22d   : > { %2653 = vmatpush3.bf16.msra.mxu0 %v2932_v0 }
 0x22e   : > { %2654 = vmatprep.subr.bf16.mxu0 %v3247_v5 }
 0x231   : > { %2655 = vmatpush3.bf16.msra.mxu0 %v2933_v1 }
 0x232   : > { %2656 = vmatprep.subr.bf16.mxu0 %v3247_v5 }
 0x235   : > { %2657 = vmatpush3.bf16.msra.mxu0 %v2934_v2 }
 0x236   : > { %2686 = vmatprep.subr.bf16.mxu0 %v3247_v5 }
 0x238   : > { %2659 = vmatmul.mubr.bf16.vlgmr.msra.gmra.mrb[4].mxu0 %v654_v57 }
 0x239   : > { %2688 = vmatprep.mubr.msk.bf16.mxu0 %vm3248_vm0, %v3247_v5  ;;  %2687 = vmatpush3.bf16.msra.mxu0 %v2936_v61 }
 0x23a   : > { %2698 = vmatprep.subr.bf16.mxu0 %v3247_v5 }
 0x2ea   : > { %v872_v4 = vpop.f32.mrb[0].mxu1 }
 0x2eb   : > { %v760_v6 = vpop.f32.mrb[0].mxu0  ;;  %v2640_v7 = vpop.f32.mrb[1].mxu1  ;;  %v873_v10 = vadd.f32 %v2471_v3, %v872_v4 }
 0x2ec   : > { %v2620_v8 = vpop.f32.mrb[1].mxu0  ;;  %v875_v9 = vpop.f32.mrb[2].mxu1  ;;  %v761_v18 = vadd.f32 %v2462_v16, %v760_v6 }
 0x2ed   : > { %v763_v11 = vpop.f32.mrb[2].mxu0  ;;  %v876_v12 = vadd.f32 %v2471_v3, %v875_v9  ;;  %v2641_v13 = vpop.f32.mrb[3].mxu1 }
 0x2ee   : > { %v2621_v14 = vpop.f32.mrb[3].mxu0  ;;  %v3707_v19 = vpack.c.bf16 %v761_v18, %v761_v18 }
 0x2ef   : > { %v3698_v15 = vpack.c.bf16 %v876_v12, %v873_v10 }
 0x2f1   : > { %1117 = vrot.lane.b32.xlu1 %v3698_v15, %s3249_s26  ;;  %v1014_v17 = vsel %vm1009_vm1, %v3698_v15, 0 }
 0x2f2   : > { %2663 = vmatpush3.bf16.xpose.msra.mxu1 %v1014_v17 }
 0x2f3   : > { %2668 = vmatprep.subr.bf16.mxu1 %v3247_v5 }
 0x2f9   : > { %2665 = vmatmul.mubr.msk.bf16.vlgmr.msra.gmra.mrb[4].mxu1 %vm1009_vm1, %v3707_v19 }
 0x2fa   : > { %2670 = vmatprep.mubr.msk.bf16.mxu1 %vm3248_vm0, %v3247_v5 }
 0x30b   : > { %v985_v21 = vpop.f32.mrb[4].mxu0 }
 0x30c   : > { %v2660_v22 = vpop.f32.mrb[5].mxu0  ;;  %v986_v24 = vadd.f32 %v2480_v20, %v985_v21 }
 0x30d   : > { %v988_v23 = vpop.f32.mrb[6].mxu0 }
 0x30e   : > { %v989_v25 = vadd.f32 %v2480_v20, %v988_v23  ;;  %v2661_v26 = vpop.f32.mrb[7].mxu0 }
 0x310   : > { %v3716_v27 = vpack.c.bf16 %v989_v25, %v986_v24 }
 0x312   : > { %2669 = vmatpush3.bf16.msra.mxu1 %v3716_v27 }
 0x313   : > { %2674 = vmatprep.subr.bf16.mxu1 %v3247_v5 }
 0x363   : > { %v1118_v38 = vpop.permute.xlu1 %1117 }
 0x364   : > { %v1123_v40 = vsel %vm1009_vm1, %v1118_v38, 0 }
 0x3cc   : > { %v1050_v28 = vpop.f32.mrb[4].mxu1 }
 0x3cd   : > { %v1056_v29 = vmul.f32 0.25, %v1050_v28  ;;  %v2666_v30 = vpop.f32.mrb[5].mxu1 }
 0x3ce   : > { %v1053_v31 = vpop.f32.mrb[6].mxu1 }
 0x3cf   : > { %v2667_v32 = vpop.f32.mrb[7].mxu1  ;;  %v1057_v33 = vsel %vm1009_vm1, %v1056_v29, -inf }
 0x3d0   : > { %1058 = vmax.xlane.f32.xlu0 %v1057_v33 }
 0x3e6   : > { %1114 = vrot.lane.b32.xlu0 %v3707_v19, %s3249_s26 }
 0x3ea   : > { %1178 = vrot.lane.b32.xlu0 %v3716_v27, %s3249_s26  ;;  %s2307_s26 = sshll.u32 %s580_s28, 4  ;;  %s3877_s26 = int_to_ptr.vmem [resolvable:$true] %s2307_s26 }
 0x45d   : > { %v1059_v34 = vpop.xlane.xlu0 %1058 }
 0x45e   : > { %v1060_v35 = vsub.f32 %v1056_v29, %v1059_v34 }
 0x460   : > { %v1061_v36 = vmul.f32 1.442695, %v1060_v35 }
 0x461   : > { %v1115_v41 = vpop.permute.xlu0 %1114 }
 0x462   : > { %2949 = vpow2.f32 %v1061_v36 }
 0x465   : > { %v1179_v42 = vpop.permute.xlu0 %1178 }
 0x46c   : > { %v2950_v37 = vpop.eup %2949 }
 0x46d   : > { %v1067_v39 = vpack.c.bf16 %v2950_v37, %v2950_v37  ;;  %v1063_v53 = vsel %vm1009_vm1, %v2950_v37, 0.0 }
 0x46f   : > { %2671 = vmatmul.mubr.msk.bf16.vlgmr.msra.gmra.mrb[8].mxu1 %vm1009_vm1, %v1067_v39 }
 0x470   : > { %2675 = vmatpush3.bf16.xpose.msra.mxu1 %v1123_v40  ;;  %2676 = vmatprep.mubr.msk.bf16.mxu1 %vm3248_vm0, %v3247_v5 }
 0x471   : > { %2680 = vmatprep.subr.bf16.mxu1 %v3247_v5 }
 0x477   : > { %2677 = vmatmul.mubr.msk.bf16.vlgmr.msra.gmra.mrb[12].mxu1 %vm1009_vm1, %v1115_v41 }
 0x478   : > { %2681 = vmatpush3.bf16.msra.mxu1 %v1179_v42  ;;  %2682 = vmatprep.mubr.msk.bf16.mxu1 %vm3248_vm0, %v3247_v5  ;;  %v2937_v42 = vld [vmem:[#allocation11 + $0x10] sm:$0xff]  }
 0x479   : > { %2692 = vmatprep.subr.bf16.mxu1 %v3247_v5 }
 0x542   : > { %v1105_v43 = vpop.f32.mrb[8].mxu1 }
 0x543   : > { %v2672_v44 = vpop.f32.mrb[9].mxu1 }
 0x544   : > { %v1108_v45 = vpop.f32.mrb[10].mxu1 }
 0x545   : > { %v2673_v46 = vpop.f32.mrb[11].mxu1 }
 0x54a   : > { %v1159_v47 = vpop.f32.mrb[12].mxu1 }
 0x54b   : > { %v1165_v48 = vmul.f32 0.25, %v1159_v47  ;;  %v2678_v49 = vpop.f32.mrb[13].mxu1 }
 0x54c   : > { %v1162_v50 = vpop.f32.mrb[14].mxu1 }
 0x54d   : > { %v2679_v51 = vpop.f32.mrb[15].mxu1  ;;  %v1166_v52 = vsel %vm1009_vm1, %v1165_v48, -inf }
 0x54e   : > { %1167 = vmax.xlane.f32.xlu1 %v1166_v52 }
 0x55f   : > { %1326 = vrot.lane.b32.xlu1 %v3698_v15, %s3250_s3 }
 0x583   : > { %1064 = vadd.xlane.f32.xlu1 %v1063_v53 }
 0x594   : > { %1386 = vrot.lane.b32.xlu1 %v3716_v27, %s3250_s3 }
 0x598   : > { %1484 = vrot.lane.b32.xlu1 %v3707_v19, %s3251_s24 }
 0x5db   : > { %v1168_v54 = vpop.xlane.xlu1 %1167 }
 0x5dc   : > { %v1169_v55 = vsub.f32 %v1165_v48, %v1168_v54 }
 0x5de   : > { %v1170_v56 = vmul.f32 1.442695, %v1169_v55 }
 0x5df   : > { %v1327_v62 = vpop.permute.xlu1 %1326 }
 0x5e0   : > { %2951 = vpow2.f32 %v1170_v56  ;;  %v1332_v13 = vsel %vm1009_vm1, %v1327_v62, 0 }
 0x5ea   : > { %v2952_v57 = vpop.eup %2951 }
 0x5eb   : > { %v1172_v59 = vsel %vm1009_vm1, %v2952_v57, 0.0  ;;  %v1176_v60 = vpack.c.bf16 %v2952_v57, %v2952_v57 }
 0x5ec   : > { %1173 = vadd.xlane.f32.xlu0 %v1172_v59 }
 0x5ed   : > { %2683 = vmatmul.mubr.msk.bf16.vlgmr.msra.gmra.mrb[16].mxu1 %vm1009_vm1, %v1176_v60 }
 0x5ee   : > { %2693 = vmatpush3.bf16.msra.mxu1 %v2935_v58  ;;  %2694 = vmatprep.mubr.msk.bf16.mxu1 %vm3248_vm0, %v3247_v5 }
 0x5ef   : > { %2704 = vmatprep.subr.bf16.mxu1 %v3247_v5 }
 0x602   : > { %1324 = vrot.lane.b32.xlu0 %v3707_v19, %s3250_s3  ;;  %s3875_s3 = scalar_lea.hbm %s3974_s14, %s2523_s7 }
 0x610   : > { %v1065_v63 = vpop.xlane.xlu1 %1064 }
 0x611   : > { %2953 = vrcp.f32 %v1065_v63 }
 0x614   : > { %v1387_v3 = vpop.permute.xlu1 %1386 }
 0x618   : > { %v1485_v41 = vpop.permute.xlu1 %1484 }
 0x61b   : > { %v2954_v0 = vpop.eup %2953 }
 0x61c   : > { %v1111_v1 = vmul.f32 %v2954_v0, %v1105_v43 }
 0x61e   : > { %v1112_v2 = vpack.c.bf16 %v1111_v1, %v1111_v1 }
 0x620   : > { %2695 = vmatmul.mubr.msk.bf16.vlgmr.msra.gmra.mrb[20].mxu1 %vm1009_vm1, %v1112_v2 }
 0x621   : > { %2705 = vmatpush3.bf16.msra.mxu1 %v1387_v3  ;;  %2706 = vmatprep.mubr.msk.bf16.mxu1 %vm3248_vm0, %v3247_v5 }
 0x622   : > { %2716 = vmatprep.subr.bf16.mxu1 %v3247_v5 }
 0x679   : > { %v1174_v4 = vpop.xlane.xlu0 %1173 }
 0x67a   : > { %2955 = vrcp.f32 %v1174_v4 }
 0x67d   : > { %v1325_v14 = vpop.permute.xlu0 %1324 }
 0x684   : > { %v2956_v6 = vpop.eup %2955 }
 0x6c0   : > { %v1218_v7 = vpop.f32.mrb[16].mxu1 }
 0x6c1   : > { %v1224_v8 = vmul.f32 %v2956_v6, %v1218_v7  ;;  %v2684_v9 = vpop.f32.mrb[17].mxu1 }
 0x6c2   : > { %v1221_v10 = vpop.f32.mrb[18].mxu1  ;;  %v2938_v9 = vld [vmem:[#allocation11 + $0x18] sm:$0xff]  }
 0x6c3   : > { %v1225_v11 = vpack.c.bf16 %v1224_v8, %v1224_v8  ;;  %v2685_v12 = vpop.f32.mrb[19].mxu1 }
 0x6c5   : > { %2689 = vmatmul.mubr.msk.bf16.vlgmr.msra.gmra.mrb[8].mxu0 %vm1009_vm1, %v1225_v11 }
 0x6c6   : > { %2699 = vmatpush3.bf16.xpose.msra.mxu0 %v1332_v13  ;;  %2700 = vmatprep.mubr.msk.bf16.mxu0 %vm3248_vm0, %v3247_v5 }
 0x6c7   : > { %2710 = vmatprep.subr.bf16.mxu0 %v3247_v5 }
 0x6cd   : > { %2701 = vmatmul.mubr.msk.bf16.vlgmr.msra.gmra.mrb[12].mxu0 %vm1009_vm1, %v1325_v14 }
 0x6ce   : > { %2712 = vmatprep.mubr.msk.bf16.mxu0 %vm3248_vm0, %v3247_v5  ;;  %2711 = vmatpush3.bf16.msra.mxu0 %v2937_v42  ;;  %v2939_v42 = vld [vmem:[#allocation11 + $0x20] sm:$0xff]  }
 0x6cf   : > { %2722 = vmatprep.subr.bf16.mxu0 %v3247_v5 }
 0x6f3   : > { %v1318_v16 = vpop.f32.mrb[20].mxu1 }
 0x6f4   : > { %v2696_v17 = vpop.f32.mrb[21].mxu1 }
 0x6f5   : > { %v1321_v18 = vpop.f32.mrb[22].mxu1 }
 0x6f6   : > { %v2697_v20 = vpop.f32.mrb[23].mxu1 }
 0x798   : > { %v1269_v21 = vpop.f32.mrb[8].mxu0 }
 0x799   : > { %v3757_v22 = vadd.f32 %v1318_v16, %v1269_v21  ;;  %v2690_v23 = vpop.f32.mrb[9].mxu0 }
 0x79a   : > { %v1272_v24 = vpop.f32.mrb[10].mxu0 }
 0x79b   : > { %v2691_v25 = vpop.f32.mrb[11].mxu0 }
 0x7a0   : > { %v1368_v26 = vpop.f32.mrb[12].mxu0 }
 0x7a1   : > { %v1374_v28 = vmul.f32 0.25, %v1368_v26  ;;  %v2702_v29 = vpop.f32.mrb[13].mxu0 }
 0x7a2   : > { %v1371_v30 = vpop.f32.mrb[14].mxu0 }
 0x7a3   : > { %v2703_v31 = vpop.f32.mrb[15].mxu0  ;;  %v1375_v32 = vsel %vm1009_vm1, %v1374_v28, -inf }
 0x7a4   : > { %1376 = vmax.xlane.f32.xlu0 %v1375_v32 }
 0x7ba   : > { %1486 = vrot.lane.b32.xlu0 %v3698_v15, %s3251_s24 }
 0x831   : > { %v1377_v33 = vpop.xlane.xlu0 %1376 }
 0x832   : > { %v1378_v34 = vsub.f32 %v1374_v28, %v1377_v33 }
 0x834   : > { %v1379_v35 = vmul.f32 1.442695, %v1378_v34 }
 0x835   : > { %v1487_v37 = vpop.permute.xlu0 %1486 }
 0x836   : > { %2957 = vpow2.f32 %v1379_v35  ;;  %v1492_v40 = vsel %vm1009_vm1, %v1487_v37, 0 }
 0x840   : > { %v2958_v36 = vpop.eup %2957 }
 0x841   : > { %v1381_v38 = vsel %vm1009_vm1, %v2958_v36, 0.0  ;;  %v1385_v39 = vpack.c.bf16 %v2958_v36, %v2958_v36 }
 0x842   : > { %1382 = vadd.xlane.f32.xlu1 %v1381_v38 }
 0x843   : > { %2707 = vmatmul.mubr.msk.bf16.vlgmr.msra.gmra.mrb[24].mxu1 %vm1009_vm1, %v1385_v39 }
 0x844   : > { %2717 = vmatpush3.bf16.xpose.msra.mxu1 %v1492_v40  ;;  %2718 = vmatprep.mubr.msk.bf16.mxu1 %vm3248_vm0, %v3247_v5 }
 0x845   : > { %2728 = vmatprep.subr.bf16.mxu1 %v3247_v5 }
 0x84b   : > { %2719 = vmatmul.mubr.msk.bf16.vlgmr.msra.gmra.mrb[28].mxu1 %vm1009_vm1, %v1485_v41 }
 0x84c   : > { %2730 = vmatprep.mubr.msk.bf16.mxu1 %vm3248_vm0, %v3247_v5  ;;  %2729 = vmatpush3.bf16.msra.mxu1 %v2938_v9  ;;  %v2940_v9 = vld [vmem:[#allocation11 + $0x28] sm:$0xff]  }
 0x84d   : > { %2740 = vmatprep.subr.bf16.mxu1 %v3247_v5 }
 0x853   : > { %1546 = vrot.lane.b32.xlu1 %v3716_v27, %s3251_s24  ;;  %s3153_s24 = scalar_lea.vmem %s3877_s26, 128 }
 0x854   : > { %p3154_p6 = scmp.ne.s32.totalorder %s3877_s26, %s3153_s24 }
 0x856   : > { %p3155_p4 = pnand %p3154_p6, %p3975_p2 }
 0x857   : > { %1644 = vrot.lane.b32.xlu1 %v3707_v19, %s3252_s6 }
 0x858   : > { %p3156_p10 = pneg %p3155_p4 }
 0x8cf   : > { %v1383_v43 = vpop.xlane.xlu1 %1382 }
 0x8d0   : > { %2959 = vrcp.f32 %v1383_v43 }
 0x8d3   : > { %v1547_v51 = vpop.permute.xlu1 %1546 }
 0x8d7   : > { %v1645_v2 = vpop.permute.xlu1 %1644 }
 0x8da   : > { %v2960_v44 = vpop.eup %2959 }
 0x916   : > { %v1426_v45 = vpop.f32.mrb[24].mxu1 }
 0x917   : > { %v1432_v46 = vmul.f32 %v2960_v44, %v1426_v45  ;;  %v2708_v47 = vpop.f32.mrb[25].mxu1 }
 0x918   : > { %v1429_v48 = vpop.f32.mrb[26].mxu1 }
 0x919   : > { %v1433_v49 = vpack.c.bf16 %v1432_v46, %v1432_v46  ;;  %v2709_v50 = vpop.f32.mrb[27].mxu1 }
 0x91b   : > { %2713 = vmatmul.mubr.msk.bf16.vlgmr.msra.gmra.mrb[16].mxu0 %vm1009_vm1, %v1433_v49 }
 0x91c   : > { %2723 = vmatpush3.bf16.msra.mxu0 %v1547_v51  ;;  %2724 = vmatprep.mubr.msk.bf16.mxu0 %vm3248_vm0, %v3247_v5 }
 0x91d   : > { %2734 = vmatprep.subr.bf16.mxu0 %v3247_v5 }
 0x91e   : > { %v1528_v52 = vpop.f32.mrb[28].mxu1 }
 0x91f   : > { %v1534_v53 = vmul.f32 0.25, %v1528_v52  ;;  %v2720_v54 = vpop.f32.mrb[29].mxu1 }
 0x920   : > { %v1531_v55 = vpop.f32.mrb[30].mxu1 }
 0x921   : > { %v2721_v56 = vpop.f32.mrb[31].mxu1  ;;  %v1535_v57 = vsel %vm1009_vm1, %v1534_v53, -inf }
 0x922   : > { %1536 = vmax.xlane.f32.xlu0 %v1535_v57 }
 0x938   : > { %1646 = vrot.lane.b32.xlu0 %v3698_v15, %s3252_s6 }
 0x9af   : > { %v1537_v58 = vpop.xlane.xlu0 %1536 }
 0x9b0   : > { %v1538_v59 = vsub.f32 %v1534_v53, %v1537_v58 }
 0x9b2   : > { %v1539_v60 = vmul.f32 1.442695, %v1538_v59 }
 0x9b3   : > { %v1647_v62 = vpop.permute.xlu0 %1646 }
 0x9b4   : > { %2961 = vpow2.f32 %v1539_v60  ;;  %v1652_v1 = vsel %vm1009_vm1, %v1647_v62, 0 }
 0x9be   : > { %v2962_v61 = vpop.eup %2961 }
 0x9bf   : > { %v1541_v63 = vsel %vm1009_vm1, %v2962_v61, 0.0  ;;  %v1545_v0 = vpack.c.bf16 %v2962_v61, %v2962_v61 }
 0x9c0   : > { %1542 = vadd.xlane.f32.xlu1 %v1541_v63 }
 0x9c1   : > { %2725 = vmatmul.mubr.msk.bf16.vlgmr.msra.gmra.mrb[20].mxu0 %vm1009_vm1, %v1545_v0 }
 0x9c2   : > { %2735 = vmatpush3.bf16.xpose.msra.mxu0 %v1652_v1  ;;  %2736 = vmatprep.mubr.msk.bf16.mxu0 %vm3248_vm0, %v3247_v5 }
 0x9c3   : > { %2746 = vmatprep.subr.bf16.mxu0 %v3247_v5 }
 0x9c9   : > { %2737 = vmatmul.mubr.msk.bf16.vlgmr.msra.gmra.mrb[24].mxu0 %vm1009_vm1, %v1645_v2 }
 0x9ca   : > { %2748 = vmatprep.mubr.msk.bf16.mxu0 %vm3248_vm0, %v3247_v5  ;;  %2747 = vmatpush3.bf16.msra.mxu0 %v2939_v42 }
 0x9cb   : > { %2758 = vmatprep.subr.bf16.mxu0 %v3247_v5 }
 0x9d1   : > { %1806 = vrot.lane.b32.xlu1 %v3698_v15, %s3253_s10 }
 0x9d5   : > { %1804 = vrot.lane.b32.xlu1 %v3707_v19, %s3253_s10 }
 0x9ee   : > { %v1477_v3 = vpop.f32.mrb[16].mxu0 }
 0x9ef   : > { %v1483_v4 = vadd.f32 %v1477_v3, %v3757_v22  ;;  %v2714_v6 = vpop.f32.mrb[17].mxu0 }
 0x9f0   : > { %v1480_v7 = vpop.f32.mrb[18].mxu0 }
 0x9f1   : > { %v2715_v8 = vpop.f32.mrb[19].mxu0 }
 0xa4d   : > { %v1543_v10 = vpop.xlane.xlu1 %1542 }
 0xa4e   : > { %2963 = vrcp.f32 %v1543_v10 }
 0xa51   : > { %v1807_v32 = vpop.permute.xlu1 %1806 }
 0xa52   : > { %v1812_v35 = vsel %vm1009_vm1, %v1807_v32, 0 }
 0xa55   : > { %v1805_v36 = vpop.permute.xlu1 %1804 }
 0xa58   : > { %v2964_v11 = vpop.eup %2963 }
 0xa94   : > { %v1586_v12 = vpop.f32.mrb[20].mxu0 }
 0xa95   : > { %v1592_v13 = vmul.f32 %v2964_v11, %v1586_v12  ;;  %v2726_v14 = vpop.f32.mrb[21].mxu0 }
 0xa96   : > { %v1589_v16 = vpop.f32.mrb[22].mxu0 }
 0xa97   : > { %v1593_v17 = vpack.c.bf16 %v1592_v13, %v1592_v13  ;;  %v2727_v18 = vpop.f32.mrb[23].mxu0 }
 0xa99   : > { %2731 = vmatmul.mubr.msk.bf16.vlgmr.msra.gmra.mrb[32].mxu1 %vm1009_vm1, %v1593_v17 }
 0xa9a   : > { %2742 = vmatprep.mubr.msk.bf16.mxu1 %vm3248_vm0, %v3247_v5 }
 0xa9c   : > { %v1688_v20 = vpop.f32.mrb[24].mxu0 }
 0xa9d   : > { %v1694_v21 = vmul.f32 0.25, %v1688_v20  ;;  %v2738_v22 = vpop.f32.mrb[25].mxu0 }
 0xa9e   : > { %v1691_v23 = vpop.f32.mrb[26].mxu0 }
 0xa9f   : > { %v2739_v24 = vpop.f32.mrb[27].mxu0  ;;  %v1695_v25 = vsel %vm1009_vm1, %v1694_v21, -inf }
 0xaa0   : > { %1696 = vmax.xlane.f32.xlu0 %v1695_v25 }
 0xab6   : > { %1706 = vrot.lane.b32.xlu0 %v3716_v27, %s3252_s6  ;;  %s3157_s6 = sshll.u32 %s3256_s18, 4  ;;  %s3158_s6 = int_to_ptr.vmem [resolvable:$false] %s3157_s6 }
 0xab7   : > { %p3160_p5 = scmp.lt.s32.totalorder %s3877_s26, %s3158_s6 }
 0xb2d   : > { %v1697_v26 = vpop.xlane.xlu0 %1696 }
 0xb2e   : > { %v1698_v28 = vsub.f32 %v1694_v21, %v1697_v26 }
 0xb30   : > { %v1699_v29 = vmul.f32 1.442695, %v1698_v28 }
 0xb31   : > { %v1707_v30 = vpop.permute.xlu0 %1706 }
 0xb32   : > { %2965 = vpow2.f32 %v1699_v29  ;;  %2741 = vmatpush3.bf16.msra.mxu1 %v1707_v30 }
 0xb33   : > { %2752 = vmatprep.subr.bf16.mxu1 %v3247_v5 }
 0xb3c   : > { %v2966_v31 = vpop.eup %2965 }
 0xb3d   : > { %v1701_v33 = vsel %vm1009_vm1, %v2966_v31, 0.0  ;;  %v1705_v34 = vpack.c.bf16 %v2966_v31, %v2966_v31 }
 0xb3e   : > { %1702 = vadd.xlane.f32.xlu1 %v1701_v33 }
 0xb3f   : > { %2743 = vmatmul.mubr.msk.bf16.vlgmr.msra.gmra.mrb[36].mxu1 %vm1009_vm1, %v1705_v34 }
 0xb40   : > { %2753 = vmatpush3.bf16.xpose.msra.mxu1 %v1812_v35  ;;  %2754 = vmatprep.mubr.msk.bf16.mxu1 %vm3248_vm0, %v3247_v5 }
 0xb41   : > { %2764 = vmatprep.subr.bf16.mxu1 %v3247_v5 }
 0xb47   : > { %2755 = vmatmul.mubr.msk.bf16.vlgmr.msra.gmra.mrb[40].mxu1 %vm1009_vm1, %v1805_v36 }
 0xb48   : > { %2766 = vmatprep.mubr.msk.bf16.mxu1 %vm3248_vm0, %v3247_v5  ;;  %2765 = vmatpush3.bf16.msra.mxu1 %v2940_v9 }
 0xb49   : > { %2776 = vmatprep.subr.bf16.mxu1 %v3247_v5 }
 0xb4f   : > { %1966 = vrot.lane.b32.xlu1 %v3698_v15, %s3254_s8 }
 0xb53   : > { %1964 = vrot.lane.b32.xlu1 %v3707_v19, %s3254_s8 }
 0xb6c   : > { %v1637_v37 = vpop.f32.mrb[32].mxu1 }
 0xb6d   : > { %v1643_v38 = vadd.f32 %v1637_v37, %v1483_v4  ;;  %v2732_v39 = vpop.f32.mrb[33].mxu1 }
 0xb6e   : > { %v1640_v40 = vpop.f32.mrb[34].mxu1 }
 0xb6f   : > { %v2733_v41 = vpop.f32.mrb[35].mxu1  ;;  %v2941_v40 = vld [vmem:[#allocation11 + $0x30] sm:$0xff]  }
 0xbcb   : > { %v1703_v43 = vpop.xlane.xlu1 %1702 }
 0xbcc   : > { %2967 = vrcp.f32 %v1703_v43 }
 0xbcf   : > { %v1967_v62 = vpop.permute.xlu1 %1966 }
 0xbd0   : > { %v1972_v1 = vsel %vm1009_vm1, %v1967_v62, 0 }
 0xbd3   : > { %v1965_v2 = vpop.permute.xlu1 %1964 }
 0xbd6   : > { %v2968_v44 = vpop.eup %2967 }
 0xc12   : > { %v1746_v45 = vpop.f32.mrb[36].mxu1 }
 0xc13   : > { %v1752_v46 = vmul.f32 %v2968_v44, %v1746_v45  ;;  %v2744_v47 = vpop.f32.mrb[37].mxu1 }
 0xc14   : > { %v1749_v48 = vpop.f32.mrb[38].mxu1 }
 0xc15   : > { %v1753_v49 = vpack.c.bf16 %v1752_v46, %v1752_v46  ;;  %v2745_v50 = vpop.f32.mrb[39].mxu1 }
 0xc17   : > { %2749 = vmatmul.mubr.msk.bf16.vlgmr.msra.gmra.mrb[28].mxu0 %vm1009_vm1, %v1753_v49 }
 0xc18   : > { %2760 = vmatprep.mubr.msk.bf16.mxu0 %vm3248_vm0, %v3247_v5 }
 0xc1a   : > { %v1848_v51 = vpop.f32.mrb[40].mxu1 }
 0xc1b   : > { %v1854_v52 = vmul.f32 0.25, %v1848_v51  ;;  %v2756_v53 = vpop.f32.mrb[41].mxu1 }
 0xc1c   : > { %v1851_v54 = vpop.f32.mrb[42].mxu1 }
 0xc1d   : > { %v2757_v55 = vpop.f32.mrb[43].mxu1  ;;  %v1855_v56 = vsel %vm1009_vm1, %v1854_v52, -inf }
 0xc1e   : > { %1856 = vmax.xlane.f32.xlu0 %v1855_v56 }
 0xc34   : > { %1866 = vrot.lane.b32.xlu0 %v3716_v27, %s3253_s10  ;;  %s3159_s10 = scalar_lea.vmem %s3158_s6, 256 }
 0xc35   : > { %p3161_p7 = scmp.lt.s32.totalorder %s3159_s10, %s3153_s24 }
 0xc37   : > { %p3162_p9 = por %p3161_p7, %p3160_p5 }
 0xc39   : > { %p3163_p1 = pnand %p3162_p9, %p3156_p10 }
 0xcab   : > { %v1857_v57 = vpop.xlane.xlu0 %1856 }
 0xcac   : > { %v1858_v58 = vsub.f32 %v1854_v52, %v1857_v57 }
 0xcae   : > { %v1859_v59 = vmul.f32 1.442695, %v1858_v58 }
 0xcaf   : > { %v1867_v60 = vpop.permute.xlu0 %1866 }
 0xcb0   : > { %2969 = vpow2.f32 %v1859_v59  ;;  %2759 = vmatpush3.bf16.msra.mxu0 %v1867_v60 }
 0xcb1   : > { %2770 = vmatprep.subr.bf16.mxu0 %v3247_v5 }
 0xcba   : > { %v2970_v61 = vpop.eup %2969 }
 0xcbb   : > { %v1861_v63 = vsel %vm1009_vm1, %v2970_v61, 0.0  ;;  %v1865_v0 = vpack.c.bf16 %v2970_v61, %v2970_v61  ;;  %v2942_v61 = vld [vmem:[#allocation11 + $0x38] sm:$0xff]  }
 0xcbc   : > { %1862 = vadd.xlane.f32.xlu0 %v1861_v63 }
 0xcbd   : > { %2761 = vmatmul.mubr.msk.bf16.vlgmr.msra.gmra.mrb[32].mxu0 %vm1009_vm1, %v1865_v0 }
 0xcbe   : > { %2771 = vmatpush3.bf16.xpose.msra.mxu0 %v1972_v1  ;;  %2772 = vmatprep.mubr.msk.bf16.mxu0 %vm3248_vm0, %v3247_v5 }
 0xcbf   : > { %2782 = vmatprep.subr.bf16.mxu0 %v3247_v5 }
 0xcc5   : > { %2773 = vmatmul.mubr.msk.bf16.vlgmr.msra.gmra.mrb[36].mxu0 %vm1009_vm1, %v1965_v2 }
 0xcc6   : > { %2784 = vmatprep.mubr.msk.bf16.mxu0 %vm3248_vm0, %v3247_v5  ;;  %2783 = vmatpush3.bf16.msra.mxu0 %v2941_v40 }
 0xcc7   : > { %2794 = vmatprep.subr.bf16.mxu0 %v3247_v5 }
 0xcd2   : > { %2026 = vrot.lane.b32.xlu0 %v3716_v27, %s3254_s8 }
 0xcd6   : > { %2124 = vrot.lane.b32.xlu0 %v3707_v19, %s3255_s23 }
 0xcea   : > { %v1797_v3 = vpop.f32.mrb[28].mxu0 }
 0xceb   : > { %v1803_v4 = vadd.f32 %v1797_v3, %v1643_v38  ;;  %v2750_v6 = vpop.f32.mrb[29].mxu0 }
 0xcec   : > { %v1800_v7 = vpop.f32.mrb[30].mxu0 }
 0xced   : > { %v2751_v8 = vpop.f32.mrb[31].mxu0 }
 0xd49   : > { %v1863_v10 = vpop.xlane.xlu0 %1862 }
 0xd4a   : > { %2971 = vrcp.f32 %v1863_v10 }
 0xd4d   : > { %v2027_v20 = vpop.permute.xlu0 %2026 }
 0xd54   : > { %v2972_v11 = vpop.eup %2971 }
 0xd90   : > { %v1906_v12 = vpop.f32.mrb[32].mxu0 }
 0xd91   : > { %v1912_v13 = vmul.f32 %v2972_v11, %v1906_v12  ;;  %v2762_v14 = vpop.f32.mrb[33].mxu0  ;;  %v2521_v12 = vld [vmem:[%s3973_s20] ss:$0 sm:$0xff] }
 0xd92   : > { %v1909_v16 = vpop.f32.mrb[34].mxu0 }
 0xd93   : > { %v1913_v17 = vpack.c.bf16 %v1912_v13, %v1912_v13  ;;  %v2763_v18 = vpop.f32.mrb[35].mxu0 }
 0xd95   : > { %2767 = vmatmul.mubr.msk.bf16.vlgmr.msra.gmra.mrb[44].mxu1 %vm1009_vm1, %v1913_v17 }
 0xd96   : > { %2777 = vmatpush3.bf16.msra.mxu1 %v2027_v20  ;;  %2778 = vmatprep.mubr.msk.bf16.mxu1 %vm3248_vm0, %v3247_v5 }
 0xd97   : > { %2788 = vmatprep.subr.bf16.mxu1 %v3247_v5 }
 0xd98   : > { %v2008_v19 = vpop.f32.mrb[36].mxu0 }
 0xd99   : > { %v2014_v21 = vmul.f32 0.25, %v2008_v19  ;;  %v2774_v22 = vpop.f32.mrb[37].mxu0 }
 0xd9a   : > { %v2011_v23 = vpop.f32.mrb[38].mxu0 }
 0xd9b   : > { %v2775_v24 = vpop.f32.mrb[39].mxu0  ;;  %v2015_v25 = vsel %vm1009_vm1, %v2014_v21, -inf }
 0xd9c   : > { %2016 = vmax.xlane.f32.xlu1 %v2015_v25 }
 0xdad   : > { %2126 = vrot.lane.b32.xlu1 %v3698_v15, %s3255_s23  ;;  %v2125_v15 = vpop.permute.xlu0 %2124 }
 0xe29   : > { %v2017_v26 = vpop.xlane.xlu1 %2016 }
 0xe2a   : > { %v2018_v28 = vsub.f32 %v2014_v21, %v2017_v26 }
 0xe2c   : > { %v2019_v29 = vmul.f32 1.442695, %v2018_v28 }
 0xe2d   : > { %v2127_v31 = vpop.permute.xlu1 %2126 }
 0xe2e   : > { %2973 = vpow2.f32 %v2019_v29  ;;  %v2132_v34 = vsel %vm1009_vm1, %v2127_v31, 0 }
 0xe38   : > { %v2974_v30 = vpop.eup %2973 }
 0xe39   : > { %v2021_v32 = vsel %vm1009_vm1, %v2974_v30, 0.0  ;;  %v2025_v33 = vpack.c.bf16 %v2974_v30, %v2974_v30 }
 0xe3a   : > { %2022 = vadd.xlane.f32.xlu1 %v2021_v32 }
 0xe3b   : > { %2779 = vmatmul.mubr.msk.bf16.vlgmr.msra.gmra.mrb[48].mxu1 %vm1009_vm1, %v2025_v33 }
 0xe3c   : > { %2789 = vmatpush3.bf16.xpose.msra.mxu1 %v2132_v34  ;;  %2790 = vmatprep.mubr.msk.bf16.mxu1 %vm3248_vm0, %v3247_v5 }
 0xe3d   : > { %2800 = vmatprep.subr.bf16.mxu1 %v3247_v5 }
 0xe43   : > { %2791 = vmatmul.mubr.msk.bf16.vlgmr.msra.gmra.mrb[52].mxu1 %vm1009_vm1, %v2125_v15 }
 0xe44   : > { %2802 = vmatprep.mubr.msk.bf16.mxu1 %vm3248_vm0, %v3247_v5  ;;  %2801 = vmatpush3.bf16.msra.mxu1 %v2942_v61 }
 0xe68   : > { %v1957_v35 = vpop.f32.mrb[44].mxu1 }
 0xe69   : > { %v1963_v36 = vadd.f32 %v1957_v35, %v1803_v4  ;;  %v2768_v37 = vpop.f32.mrb[45].mxu1 }
 0xe6a   : > { %v1960_v38 = vpop.f32.mrb[46].mxu1 }
 0xe6b   : > { %v2769_v39 = vpop.f32.mrb[47].mxu1 }
 0xec7   : > { %v2023_v41 = vpop.xlane.xlu1 %2022 }
 0xec8   : > { %2975 = vrcp.f32 %v2023_v41 }
 0xed2   : > { %v2976_v42 = vpop.eup %2975 }
 0xf0e   : > { %v2066_v43 = vpop.f32.mrb[48].mxu1 }
 0xf0f   : > { %v2072_v44 = vmul.f32 %v2976_v42, %v2066_v43  ;;  %v2780_v45 = vpop.f32.mrb[49].mxu1 }
 0xf10   : > { %v2069_v46 = vpop.f32.mrb[50].mxu1 }
 0xf11   : > { %v2073_v47 = vpack.c.bf16 %v2072_v44, %v2072_v44  ;;  %v2781_v48 = vpop.f32.mrb[51].mxu1 }
 0xf13   : > { %2785 = vmatmul.mubr.msk.bf16.vlgmr.msra.gmra.mrb[40].mxu0 %vm1009_vm1, %v2073_v47 }
 0xf14   : > { %2796 = vmatprep.mubr.msk.bf16.mxu0 %vm3248_vm0, %v3247_v5 }
 0xf16   : > { %v2168_v49 = vpop.f32.mrb[52].mxu1 }
 0xf17   : > { %v2174_v50 = vmul.f32 0.25, %v2168_v49  ;;  %v2792_v51 = vpop.f32.mrb[53].mxu1 }
 0xf18   : > { %v2171_v52 = vpop.f32.mrb[54].mxu1 }
 0xf19   : > { %v2793_v53 = vpop.f32.mrb[55].mxu1  ;;  %v2175_v54 = vsel %vm1009_vm1, %v2174_v50, -inf }
 0xf1a   : > { %2176 = vmax.xlane.f32.xlu0 %v2175_v54 }
 0xf30   : > { %2186 = vrot.lane.b32.xlu0 %v3716_v27, %s3255_s23 }
 0xfa7   : > { %v2177_v55 = vpop.xlane.xlu0 %2176 }
 0xfa8   : > { %v2178_v56 = vsub.f32 %v2174_v50, %v2177_v55 }
 0xfaa   : > { %v2179_v57 = vmul.f32 1.442695, %v2178_v56 }
 0xfab   : > { %v2187_v58 = vpop.permute.xlu0 %2186 }
 0xfac   : > { %2977 = vpow2.f32 %v2179_v57  ;;  %2795 = vmatpush3.bf16.msra.mxu0 %v2187_v58 }
 0xfb6   : > { %v2978_v59 = vpop.eup %2977 }
 0xfb7   : > { %v2181_v5 = vsel %vm1009_vm1, %v2978_v59, 0.0  ;;  %v2185_v60 = vpack.c.bf16 %v2978_v59, %v2978_v59 }
 0xfb8   : > { %2182 = vadd.xlane.f32.xlu1 %v2181_v5 }
 0xfb9   : > { %2797 = vmatmul.mubr.msk.bf16.vlgmr.msra.gmra.mrb[44].mxu0 %vm1009_vm1, %v2185_v60 }
 0xfe6   : > { %v2117_v62 = vpop.f32.mrb[40].mxu0 }
 0xfe7   : > { %v2123_v63 = vadd.f32 %v2117_v62, %v1963_v36  ;;  %v2786_v0 = vpop.f32.mrb[41].mxu0 }
 0xfe8   : > { %v2120_v27 = vpop.f32.mrb[42].mxu0 }
 0xfe9   : > { %v2787_v1 = vpop.f32.mrb[43].mxu0 }
0x1045   : > { %v2183_v2 = vpop.xlane.xlu1 %2182 }
0x1046   : > { %2979 = vrcp.f32 %v2183_v2 }
0x1050   : > { %v2980_v3 = vpop.eup %2979 }
0x108c   : > { %v2226_v4 = vpop.f32.mrb[44].mxu0 }
0x108d   : > { %v2232_v6 = vmul.f32 %v2980_v3, %v2226_v4  ;;  %v2798_v7 = vpop.f32.mrb[45].mxu0 }
0x108e   : > { %v2229_v8 = vpop.f32.mrb[46].mxu0 }
0x108f   : > { %v2233_v9 = vpack.c.bf16 %v2232_v6, %v2232_v6  ;;  %v2799_v10 = vpop.f32.mrb[47].mxu0 }
0x1091   : > { %2803 = vmatmul.mubr.msk.bf16.vlgmr.msra.gmra.mrb[56].mxu1 %vm1009_vm1, %v2233_v9 }
0x1164   : > { %v2277_v11 = vpop.f32.mrb[56].mxu1 }
0x1165   : > { %v2283_v13 = vadd.f32 %v2277_v11, %v2123_v63  ;;  %v2804_v14 = vpop.f32.mrb[57].mxu1 }
0x1166   : > { %v2280_v16 = vpop.f32.mrb[58].mxu1 }
0x1167   : > { %v2291_v17 = vadd.f32 %v2521_v12, %v2283_v13  ;;  %v2805_v18 = vpop.f32.mrb[59].mxu1 }
0x1169   : > { %2292 = vst [vmem:[%s580_s28] sm:$0xff] %v2291_v17 }
0x116a   : > { %3166 = shalt.err (!%p3163_p1)
}
0x116b   : > { %s3167_s13 = scalar_lea.hbm %s3875_s3, 128  ;;  %s3171_s11 = scalar_lea.hbm %s3974_s14, 256 }
0x116c   : > { %p3168_p11 = scmp.ne.s32.totalorder %s3875_s3, %s3167_s13  ;;  %p3172_p3 = scmp.lt.u32.totalorder %s3875_s3, %s3974_s14 }
0x116d   : > { %p3173_p13 = scmp.lt.u32.totalorder %s3171_s11, %s3167_s13  ;;  %p3175_p6 = scmp.lt.u32.totalorder %s3167_s13, %s3875_s3 }
0x116e   : > { %p3169_p8 = pnand %p3168_p11, %p3975_p2 }
0x116f   : > { %p3174_p0 = por %p3173_p13, %p3172_p3 }
0x1170   : > { %p3170_p12 = pneg %p3169_p8 }
0x1171   : > { %p3176_p4 = por %p3175_p6, %p3174_p0 }
0x1173   : > { %p3177_p10 = pnand %p3176_p4, %p3170_p12 }
0x1175   : > { %3180 = shalt.err (!%p3177_p10)
}
0x1176   : > { %2826 = dma.vmem_to_hbm [thread:$0]  (%p3975_p2), %s3877_s26, 128, %s3875_s3, %s2294_s19  }
0x1177 PF: > { %s2319_s7 = sand.u32 1, %s3223_s29   ;;  %p3976_p5 = scmp.ne.s32.totalorder %s3958_s17, 0 }
0x1178   : > { %p3977_p7 = scmp.ge.s32.totalorder %s3235_s16, 2  ;;  %s2320_s28 = scalar_lea.sflag [#allocation4], %s2319_s7 }
0x117a   : > { %p2849_p9 = pnand %p3977_p7, %p3976_p5 }
0x117c   : > { %3218 = dma.done.wait (!%p2849_p9), %s2320_s28, 128  }
0x117d   : > { %3220 = vsyncadd (!%p2849_p9), %s2320_s28, 4294967168  ;;  %p32_p1 = scmp.ge.s32.totalorder %s3484_s21, 4   ;;  %s3978_s29 = smov %s3227_s30 }
0x117e   : > { %s3979_s30 = smov %s3231_s15  ;;  %s3980_s15 = smov %s3495_s27 }
0x117f   : > { %s3981_s16 = smov %s3484_s21  ;;  %34 = sbr.rel (!%p32_p1) target bundleno = 20 (0x14), region = 150 }
0x1186   :  { %2325 = vsyncpa [#allocation3], 1 }
0x1187   :  { %2327 = vsyncpa [#allocation3 + $0x1], 1 }
0x1188   :  { %2328 = vsyncpa [#allocation6], 1 }
0x1189   :  { %2330 = vsyncpa [#allocation6 + $0x1], 1 }
0x118a   :  { %2331 = vsyncpa [#allocation9], 1 }
0x118b   :  { %2332 = vsyncpa [#allocation12], 1 }
0x118c   :  { %2333 = vsyncpa [#allocation4], 1 }
0x118d   :  { %2335 = vsyncpa [#allocation4 + $0x1], 1 }

</bundles_post_ra>
